<compile_context>
chip_gen: v7x
topology: tpu7x:2x2x1
jax: 0.10.0
libtpu: 0.0.40
codegen_flags: <defaults>
</compile_context>

<pallas_src>
import functools
import math

import jax
import jax.numpy as jnp
from jax.experimental import pallas as pl
from jax.experimental.pallas import tpu as pltpu


def _round_up(x, m):
    return (x + m - 1) // m * m


def _vmem_capacity_bytes():
    """Per-core VMEM capacity (generation aware), with a conservative fallback."""
    try:
        info = pltpu.get_tpu_info()
        cap = getattr(info, "vmem_capacity_bytes", None)
        if cap:
            return int(cap)
    except Exception:
        pass
    return 64 * 1024 * 1024  # v7x per-TensorCore VMEM (the smallest current part)


# ---------------------------------------------------------------------------
# Path 1: scalar-prefetched HBM row gather, cross-step double-buffered DMAs.
# ---------------------------------------------------------------------------
def _gather_kernel(ids_ref, emb_hbm, out_ref, buf, sem, *, token_tile, scale):
    # ids_ref : SMEM (N_seg,) int32           (scalar-prefetched token ids)
    # emb_hbm : HBM  (vocab, d_model)         (memory_space=pl.ANY)
    # out_ref : VMEM (token_tile, d_model)
    # buf     : VMEM (2, token_tile, d_model) cross-step double buffer
    # sem     : DMA semaphores (2,)           one per staging slot
    step = pl.program_id(0)
    nsteps = pl.num_programs(0)
    slot = step & 1
    nxt_slot = (step + 1) & 1

    def issue_rows(block_idx, dst_slot):
        # One small row DMA per token; the static Python loop fully unrolls into
        # straight-line DMA issues (static dst offsets, no scalar-loop overhead).
        # All copies for a block signal the same per-slot semaphore.
        base = block_idx * token_tile
        for t in range(token_tile):
            row = ids_ref[base + t]          # ids are clamped in the wrapper
            pltpu.make_async_copy(
                emb_hbm.at[pl.ds(row, 1)],       # (1, d_model) HBM row
                buf.at[dst_slot, pl.ds(t, 1)],   # (1, d_model) staging slot row
                sem.at[dst_slot],
            ).start()

    # Prologue: block 0 has no previous step to hide behind.
    @pl.when(step == 0)
    def _():
        issue_rows(0, 0)

    # Steady state: issue NEXT block's rows before draining the current one,
    # so their HBM latency overlaps this step's drain/scale/writeback.
    @pl.when(step + 1 < nsteps)
    def _():
        issue_rows(step + 1, nxt_slot)

    # Single aggregate wait for the current block (replaces token_tile per-row
    # waits): DMA semaphores count bytes, and every row copy for this block
    # signaled sem[slot], so waiting on a (token_tile, d_model)-sized
    # descriptor drains exactly this block.  The src of a wait-only descriptor
    # is never dereferenced (it only sizes the wait), so we pass the
    # destination view twice — no placeholder HBM row needed.
    blk = buf.at[slot]
    pltpu.make_async_copy(blk, blk, sem.at[slot]).wait()

    out_ref[...] = (buf[slot] * scale).astype(out_ref.dtype)


def _embeddings_gather_call(ids_seg, emb_table, *, token_tile):
    n_seg = ids_seg.shape[0]                 # multiple of token_tile
    vocab, d_model = emb_table.shape
    scale = float(math.sqrt(d_model))
    grid = (n_seg // token_tile,)

    kernel = functools.partial(_gather_kernel, token_tile=token_tile, scale=scale)

    itemsize = jnp.dtype(emb_table.dtype).itemsize
    bytes_moved = int(2 * n_seg * d_model * itemsize + n_seg * 4)

    # TODO(synk): on v7x (2 TensorCores) a leading size-2 "parallel" core axis
    # with per-core prefetch chains would recover megacore sharding; the grid
    # axis here must stay "arbitrary" because the staging buffer carries state.
    return pl.pallas_call(
        kernel,
        out_shape=jax.ShapeDtypeStruct((n_seg, d_model), emb_table.dtype),
        grid_spec=pltpu.PrefetchScalarGridSpec(
            num_scalar_prefetch=1,                          # ids -> SMEM
            grid=grid,
            in_specs=[pl.BlockSpec(memory_space=pl.ANY)],   # table stays in HBM
            # d_model >= 128 keeps output stores lane-dense (unmasked vst).
            out_specs=pl.BlockSpec((token_tile, d_model), lambda i, ids: (i, 0)),
            scratch_shapes=[
                pltpu.VMEM((2, token_tile, d_model), emb_table.dtype),
                pltpu.SemaphoreType.DMA((2,)),
            ],
        ),
        compiler_params=pltpu.CompilerParams(
            dimension_semantics=("arbitrary",)),
        cost_estimate=pl.CostEstimate(
            flops=n_seg * d_model,
            transcendentals=0,
            bytes_accessed=bytes_moved),
    )(ids_seg, emb_table)


def _embeddings_gather(ids_flat, emb_table, *, token_tile, max_tokens_per_call):
    # Cap tokens per pallas_call: 1-D SMEM arrays pad to next_pow2(4N) bytes,
    # so scalar-prefetching an unbounded id array would eventually blow SMEM.
    N_pad = ids_flat.shape[0]
    cap = max(token_tile, (max_tokens_per_call // token_tile) * token_tile)
    parts = [
        _embeddings_gather_call(ids_flat[s:s + cap], emb_table,
                                token_tile=token_tile)
        for s in range(0, N_pad, cap)
    ]
    return parts[0] if len(parts) == 1 else jnp.concatenate(parts, axis=0)


# ---------------------------------------------------------------------------
# Path 2: one-hot MXU matmul, resident single-buffered table, vocab-tiled.
# ---------------------------------------------------------------------------
def _onehot_kernel(ids_ref, emb_ref, out_ref, acc_ref, *,
                   vocab_tile, scale, mm_dtype):
    # ids_ref : VMEM (token_tile, 1) int32
    # emb_ref : VMEM (vocab_pad, d_model) mm_dtype   (resident, single-buffered)
    # out_ref : VMEM (token_tile, d_model)
    # acc_ref : VMEM (token_tile, d_model) f32       (carried across the K axis)
    k = pl.program_id(1)
    nk = pl.num_programs(1)

    @pl.when(k == 0)
    def _():
        acc_ref[...] = jnp.zeros_like(acc_ref)

    ids = ids_ref[...]                                      # (T, 1)
    tn = ids.shape[0]
    base = pl.multiple_of(k * vocab_tile, vocab_tile)

    # Only a (token_tile, vocab_tile) one-hot per step (bounded vreg/VMEM
    # pressure).  32-bit compare, single cast to the matmul dtype (v5e VALUs
    # have no native bf16); one-hot values are exactly 1.0.
    col = jax.lax.broadcasted_iota(jnp.int32, (tn, vocab_tile), 1) + k * vocab_tile
    onehot = jnp.where(col == ids, 1.0, 0.0).astype(mm_dtype)

    tab = emb_ref[pl.ds(base, vocab_tile), :]               # (vocab_tile, d_model)
    acc_ref[...] += jnp.dot(onehot, tab, preferred_element_type=jnp.float32)

    # TODO(synk): with ids scalar-prefetched, empty (i, k) vocab tiles could be
    # skipped with pl.when (>99% of the MACs are zeros for large vocab).

    @pl.when(k == nk - 1)
    def _():
        # sqrt(d_model) applied in the f32 epilogue (free under MXU slack, and
        # avoids an extra bf16 rounding of the scale on every product).
        out_ref[...] = (acc_ref[...] * scale).astype(out_ref.dtype)


def _embeddings_onehot(ids_2d, emb_table, out_dtype, *, token_tile, vocab_tile,
                       use_bf16):
    N_pad = ids_2d.shape[0]
    vocab, d_model = emb_table.shape
    scale = float(math.sqrt(d_model))
    mm_dtype = jnp.bfloat16 if use_bf16 else emb_table.dtype

    vt = max(8, min(_round_up(vocab_tile, 8), _round_up(vocab, 8)))
    vocab_pad = _round_up(vocab, vt)

    # One-time cast (halves the resident table and HBM->VMEM traffic); padded
    # rows are zero and can never be selected (ids are clamped to vocab-1).
    table = emb_table.astype(mm_dtype)
    if vocab_pad != vocab:
        table = jnp.pad(table, ((0, vocab_pad - vocab), (0, 0)))

    grid = (N_pad // token_tile, vocab_pad // vt)
    kernel = functools.partial(_onehot_kernel, vocab_tile=vt, scale=scale,
                               mm_dtype=mm_dtype)

    vmem_cap = _vmem_capacity_bytes()
    vmem_limit = int(min(vmem_cap * 3 // 4, 96 * 1024 * 1024))

    return pl.pallas_call(
        kernel,
        out_shape=jax.ShapeDtypeStruct((N_pad, d_model), out_dtype),
        grid_spec=pltpu.PrefetchScalarGridSpec(
            num_scalar_prefetch=0,
            grid=grid,
            in_specs=[
                pl.BlockSpec((token_tile, 1), lambda i, k: (i, 0)),
                # Resident table: constant index_map, single-buffered (the
                # default 2-deep pipeline would just double its VMEM footprint).
                pl.BlockSpec((vocab_pad, d_model), lambda i, k: (0, 0),
                             pipeline_mode=pl.Buffered(1)),
            ],
            out_specs=pl.BlockSpec((token_tile, d_model), lambda i, k: (i, 0)),
            scratch_shapes=[pltpu.VMEM((token_tile, d_model), jnp.float32)],
        ),
        compiler_params=pltpu.CompilerParams(
            dimension_semantics=("parallel", "arbitrary"),
            vmem_limit_bytes=vmem_limit),
        cost_estimate=pl.CostEstimate(
            flops=2 * N_pad * vocab_pad * d_model,
            transcendentals=0,
            bytes_accessed=int(N_pad * 4
                               + vocab_pad * d_model * jnp.dtype(mm_dtype).itemsize
                               + N_pad * d_model * jnp.dtype(out_dtype).itemsize)),
    )(ids_2d, table)


# ---------------------------------------------------------------------------
# Public wrapper: forward(x) = emb_table[x] * sqrt(d_model)
# ---------------------------------------------------------------------------
def embeddings_forward(ids, emb_table, *, token_tile=256, vocab_tile=1024,
                       method=None, use_bf16=True, max_tokens_per_call=32768):
    """ids: int array (...,); emb_table: (vocab, d_model) -> (..., d_model)."""
    vocab, d_model = emb_table.shape
    orig_shape = ids.shape
    N = math.prod(orig_shape)

    # Token tile: big enough to amortize ~0.35us/step grid overhead, multiple
    # of 8 (sublane packing), clamped so tiny inputs don't over-pad.
    tile = max(8, min(_round_up(token_tile, 8), _round_up(N, 8)))
    N_pad = _round_up(N, tile)

    # TODO(synk): PyTorch nn.Embedding raises on out-of-range ids; kernels
    # cannot throw, so we clamp (also keeps padded ids and DMA addresses safe).
    ids_flat = jnp.clip(ids.reshape(N).astype(jnp.int32), 0, vocab - 1)
    if N_pad != N:
        ids_flat = jnp.pad(ids_flat, (0, N_pad - N))    # pad with valid id 0

    if method is None:
        # Generation-aware budget for the resident (single-buffered) table:
        # <= 1/4 of per-core VMEM (on v7x each of the 2 TCs holds its own copy
        # under "parallel").  Narrow d_model (<256) underfills the 256-wide
        # v6e/v7x MXU, so bias toward the gather path there.
        itemsize = 2 if use_bf16 else jnp.dtype(emb_table.dtype).itemsize
        table_bytes = vocab * d_model * itemsize
        budget = _vmem_capacity_bytes() // 4
        if d_model < 256:
            budget = min(budget, 2 * 1024 * 1024)
        method = "onehot" if table_bytes <= budget else "gather"

    if method == "gather":
        out = _embeddings_gather(ids_flat, emb_table, token_tile=tile,
                                 max_tokens_per_call=max_tokens_per_call)
    elif method == "onehot":
        out = _embeddings_onehot(ids_flat.reshape(N_pad, 1), emb_table,
                                 emb_table.dtype, token_tile=tile,
                                 vocab_tile=vocab_tile, use_bf16=use_bf16)
    else:
        raise ValueError(f"unknown method: {method}")

    return out[:N].reshape(*orig_shape, d_model)


if __name__ == "__main__":
    # Small shapes consistent with the module; S=9 exercises remainder padding
    # and d_model=128 keeps output stores lane-dense.
    B, S = 2, 9
    vocab, d_model = 512, 128

    key = jax.random.PRNGKey(0)
    k_emb, k_ids = jax.random.split(key)

    # nn.Embedding default init: weights ~ N(0, 1)
    emb_table = jax.random.normal(k_emb, (vocab, d_model), dtype=jnp.float32)
    ids = jax.random.randint(k_ids, (B, S), 0, vocab, dtype=jnp.int32)

    ref = emb_table[ids] * math.sqrt(d_model)

    # Production path: double-buffered HBM row gather (f32-exact).
    out_gather = jax.block_until_ready(
        embeddings_forward(ids, emb_table, method="gather"))
    assert out_gather.shape == (B, S, d_model)
    assert jnp.allclose(out_gather, ref, rtol=1e-5, atol=1e-5), "gather mismatch"

    # Small-vocab fast path: bf16 table, vocab-tiled one-hot, f32 accumulation
    # and f32 epilogue scale.
    out_onehot = jax.block_until_ready(
        embeddings_forward(ids, emb_table, method="onehot"))
    assert out_onehot.shape == (B, S, d_model)
    assert jnp.allclose(out_onehot, ref, rtol=2e-2, atol=2e-2), "one-hot mismatch"

    # Auto heuristic (generation-aware VMEM budget + MXU-width bias).
    out_auto = jax.block_until_ready(embeddings_forward(ids, emb_table))
    assert out_auto.shape == (B, S, d_model)
    assert jnp.allclose(out_auto, ref, rtol=2e-2, atol=2e-2), "auto mismatch"

    print("KERNEL_OK")
</pallas_src>

<mosaic_0001>
module attributes {stable_mosaic.version = 11 : i64} {
  func.func @_gather_kernel(%arg0: i32, %arg1: memref<24xi32, #tpu.memory_space<smem>>, %arg2: memref<512x128xf32, #tpu.memory_space<any>>, %arg3: memref<24x128xf32, #tpu.memory_space<vmem>>, %arg4: memref<2x24x128xf32, #tpu.memory_space<vmem>>, %arg5: memref<2x!tpu.dma_semaphore, #tpu.memory_space<semaphore_mem>>) attributes {dimension_semantics = [#tpu.dimension_semantics<arbitrary>], iteration_bounds = array<i64: 1>, scalar_prefetch = 1 : i64, scratch_operands = 2 : i64, tpu.core_type = #tpu.core_type<tc>, window_params = [{}, {transform_indices = @transform_1, window_bounds = array<i64: 24, 128>}]} {
    %c1_i32 = arith.constant 1 : i32
    %0 = arith.andi %arg0, %c1_i32 : i32
    %c1_i32_0 = arith.constant 1 : i32
    %1 = arith.addi %arg0, %c1_i32_0 : i32
    %c1_i32_1 = arith.constant 1 : i32
    %2 = arith.andi %1, %c1_i32_1 : i32
    %c0_i32 = arith.constant 0 : i32
    %3 = arith.cmpi eq, %arg0, %c0_i32 : i32
    %4 = arith.extui %3 : i1 to i32
    %c0_i32_2 = arith.constant 0 : i32
    %5 = arith.cmpi ne, %4, %c0_i32_2 : i32
    scf.if %5 {
      %c0_13 = arith.constant 0 : index
      %22 = memref.load %arg1[%c0_13] : memref<24xi32, #tpu.memory_space<smem>>
      %c0_i32_14 = arith.constant 0 : i32
      %c0_i32_15 = arith.constant 0 : i32
      %c0_i32_16 = arith.constant 0 : i32
      %23 = tpu.memref_slice %arg2[%22, %c0_i32_16] : memref<512x128xf32, #tpu.memory_space<any>> -> memref<1x128xf32, #tpu.memory_space<any>>
      %c0_i32_17 = arith.constant 0 : i32
      %c0_i32_18 = arith.constant 0 : i32
      %24 = tpu.memref_slice %arg4[%c0_i32_14, %c0_i32_17, %c0_i32_18] : memref<2x24x128xf32, #tpu.memory_space<vmem>> -> memref<1x1x128xf32, #tpu.memory_space<vmem>>
      %25 = tpu.memref_squeeze %24 : memref<1x1x128xf32, #tpu.memory_space<vmem>> -> memref<1x128xf32, #tpu.memory_space<vmem>>
      %26 = tpu.memref_slice %arg5[%c0_i32_15] : memref<2x!tpu.dma_semaphore, #tpu.memory_space<semaphore_mem>> -> memref<1x!tpu.dma_semaphore, #tpu.memory_space<semaphore_mem>>
      %27 = tpu.memref_squeeze %26 : memref<1x!tpu.dma_semaphore, #tpu.memory_space<semaphore_mem>> -> memref<!tpu.dma_semaphore, #tpu.memory_space<semaphore_mem>>
      tpu.enqueue_dma source(%23 : memref<1x128xf32, #tpu.memory_space<any>>) target(%25 : memref<1x128xf32, #tpu.memory_space<vmem>>) target_semaphore(%27 : memref<!tpu.dma_semaphore, #tpu.memory_space<semaphore_mem>>)
      %c1 = arith.constant 1 : index
      %28 = memref.load %arg1[%c1] : memref<24xi32, #tpu.memory_space<smem>>
      %c0_i32_19 = arith.constant 0 : i32
      %c0_i32_20 = arith.constant 0 : i32
      %c0_i32_21 = arith.constant 0 : i32
      %29 = tpu.memref_slice %arg2[%28, %c0_i32_21] : memref<512x128xf32, #tpu.memory_space<any>> -> memref<1x128xf32, #tpu.memory_space<any>>
      %c1_i32_22 = arith.constant 1 : i32
      %c0_i32_23 = arith.constant 0 : i32
      %30 = tpu.memref_slice %arg4[%c0_i32_19, %c1_i32_22, %c0_i32_23] : memref<2x24x128xf32, #tpu.memory_space<vmem>> -> memref<1x1x128xf32, #tpu.memory_space<vmem>>
      %31 = tpu.memref_squeeze %30 : memref<1x1x128xf32, #tpu.memory_space<vmem>> -> memref<1x128xf32, #tpu.memory_space<vmem>>
      %32 = tpu.memref_slice %arg5[%c0_i32_20] : memref<2x!tpu.dma_semaphore, #tpu.memory_space<semaphore_mem>> -> memref<1x!tpu.dma_semaphore, #tpu.memory_space<semaphore_mem>>
      %33 = tpu.memref_squeeze %32 : memref<1x!tpu.dma_semaphore, #tpu.memory_space<semaphore_mem>> -> memref<!tpu.dma_semaphore, #tpu.memory_space<semaphore_mem>>
      tpu.enqueue_dma source(%29 : memref<1x128xf32, #tpu.memory_space<any>>) target(%31 : memref<1x128xf32, #tpu.memory_space<vmem>>) target_semaphore(%33 : memref<!tpu.dma_semaphore, #tpu.memory_space<semaphore_mem>>)
      %c2 = arith.constant 2 : index
      %34 = memref.load %arg1[%c2] : memref<24xi32, #tpu.memory_space<smem>>
      %c0_i32_24 = arith.constant 0 : i32
      %c0_i32_25 = arith.constant 0 : i32
      %c0_i32_26 = arith.constant 0 : i32
      %35 = tpu.memref_slice %arg2[%34, %c0_i32_26] : memref<512x128xf32, #tpu.memory_space<any>> -> memref<1x128xf32, #tpu.memory_space<any>>
      %c2_i32 = arith.constant 2 : i32
      %c0_i32_27 = arith.constant 0 : i32
      %36 = tpu.memref_slice %arg4[%c0_i32_24, %c2_i32, %c0_i32_27] : memref<2x24x128xf32, #tpu.memory_space<vmem>> -> memref<1x1x128xf32, #tpu.memory_space<vmem>>
      %37 = tpu.memref_squeeze %36 : memref<1x1x128xf32, #tpu.memory_space<vmem>> -> memref<1x128xf32, #tpu.memory_space<vmem>>
      %38 = tpu.memref_slice %arg5[%c0_i32_25] : memref<2x!tpu.dma_semaphore, #tpu.memory_space<semaphore_mem>> -> memref<1x!tpu.dma_semaphore, #tpu.memory_space<semaphore_mem>>
      %39 = tpu.memref_squeeze %38 : memref<1x!tpu.dma_semaphore, #tpu.memory_space<semaphore_mem>> -> memref<!tpu.dma_semaphore, #tpu.memory_space<semaphore_mem>>
      tpu.enqueue_dma source(%35 : memref<1x128xf32, #tpu.memory_space<any>>) target(%37 : memref<1x128xf32, #tpu.memory_space<vmem>>) target_semaphore(%39 : memref<!tpu.dma_semaphore, #tpu.memory_space<semaphore_mem>>)
      %c3 = arith.constant 3 : index
      %40 = memref.load %arg1[%c3] : memref<24xi32, #tpu.memory_space<smem>>
      %c0_i32_28 = arith.constant 0 : i32
      %c0_i32_29 = arith.constant 0 : i32
      %c0_i32_30 = arith.constant 0 : i32
      %41 = tpu.memref_slice %arg2[%40, %c0_i32_30] : memref<512x128xf32, #tpu.memory_space<any>> -> memref<1x128xf32, #tpu.memory_space<any>>
      %c3_i32 = arith.constant 3 : i32
      %c0_i32_31 = arith.constant 0 : i32
      %42 = tpu.memref_slice %arg4[%c0_i32_28, %c3_i32, %c0_i32_31] : memref<2x24x128xf32, #tpu.memory_space<vmem>> -> memref<1x1x128xf32, #tpu.memory_space<vmem>>
      %43 = tpu.memref_squeeze %42 : memref<1x1x128xf32, #tpu.memory_space<vmem>> -> memref<1x128xf32, #tpu.memory_space<vmem>>
      %44 = tpu.memref_slice %arg5[%c0_i32_29] : memref<2x!tpu.dma_semaphore, #tpu.memory_space<semaphore_mem>> -> memref<1x!tpu.dma_semaphore, #tpu.memory_space<semaphore_mem>>
      %45 = tpu.memref_squeeze %44 : memref<1x!tpu.dma_semaphore, #tpu.memory_space<semaphore_mem>> -> memref<!tpu.dma_semaphore, #tpu.memory_space<semaphore_mem>>
      tpu.enqueue_dma source(%41 : memref<1x128xf32, #tpu.memory_space<any>>) target(%43 : memref<1x128xf32, #tpu.memory_space<vmem>>) target_semaphore(%45 : memref<!tpu.dma_semaphore, #tpu.memory_space<semaphore_mem>>)
      %c4 = arith.constant 4 : index
      %46 = memref.load %arg1[%c4] : memref<24xi32, #tpu.memory_space<smem>>
      %c0_i32_32 = arith.constant 0 : i32
      %c0_i32_33 = arith.constant 0 : i32
      %c0_i32_34 = arith.constant 0 : i32
      %47 = tpu.memref_slice %arg2[%46, %c0_i32_34] : memref<512x128xf32, #tpu.memory_space<any>> -> memref<1x128xf32, #tpu.memory_space<any>>
      %c4_i32 = arith.constant 4 : i32
      %c0_i32_35 = arith.constant 0 : i32
      %48 = tpu.memref_slice %arg4[%c0_i32_32, %c4_i32, %c0_i32_35] : memref<2x24x128xf32, #tpu.memory_space<vmem>> -> memref<1x1x128xf32, #tpu.memory_space<vmem>>
      %49 = tpu.memref_squeeze %48 : memref<1x1x128xf32, #tpu.memory_space<vmem>> -> memref<1x128xf32, #tpu.memory_space<vmem>>
      %50 = tpu.memref_slice %arg5[%c0_i32_33] : memref<2x!tpu.dma_semaphore, #tpu.memory_space<semaphore_mem>> -> memref<1x!tpu.dma_semaphore, #tpu.memory_space<semaphore_mem>>
      %51 = tpu.memref_squeeze %50 : memref<1x!tpu.dma_semaphore, #tpu.memory_space<semaphore_mem>> -> memref<!tpu.dma_semaphore, #tpu.memory_space<semaphore_mem>>
      tpu.enqueue_dma source(%47 : memref<1x128xf32, #tpu.memory_space<any>>) target(%49 : memref<1x128xf32, #tpu.memory_space<vmem>>) target_semaphore(%51 : memref<!tpu.dma_semaphore, #tpu.memory_space<semaphore_mem>>)
      %c5 = arith.constant 5 : index
      %52 = memref.load %arg1[%c5] : memref<24xi32, #tpu.memory_space<smem>>
      %c0_i32_36 = arith.constant 0 : i32
      %c0_i32_37 = arith.constant 0 : i32
      %c0_i32_38 = arith.constant 0 : i32
      %53 = tpu.memref_slice %arg2[%52, %c0_i32_38] : memref<512x128xf32, #tpu.memory_space<any>> -> memref<1x128xf32, #tpu.memory_space<any>>
      %c5_i32 = arith.constant 5 : i32
      %c0_i32_39 = arith.constant 0 : i32
      %54 = tpu.memref_slice %arg4[%c0_i32_36, %c5_i32, %c0_i32_39] : memref<2x24x128xf32, #tpu.memory_space<vmem>> -> memref<1x1x128xf32, #tpu.memory_space<vmem>>
      %55 = tpu.memref_squeeze %54 : memref<1x1x128xf32, #tpu.memory_space<vmem>> -> memref<1x128xf32, #tpu.memory_space<vmem>>
      %56 = tpu.memref_slice %arg5[%c0_i32_37] : memref<2x!tpu.dma_semaphore, #tpu.memory_space<semaphore_mem>> -> memref<1x!tpu.dma_semaphore, #tpu.memory_space<semaphore_mem>>
      %57 = tpu.memref_squeeze %56 : memref<1x!tpu.dma_semaphore, #tpu.memory_space<semaphore_mem>> -> memref<!tpu.dma_semaphore, #tpu.memory_space<semaphore_mem>>
      tpu.enqueue_dma source(%53 : memref<1x128xf32, #tpu.memory_space<any>>) target(%55 : memref<1x128xf32, #tpu.memory_space<vmem>>) target_semaphore(%57 : memref<!tpu.dma_semaphore, #tpu.memory_space<semaphore_mem>>)
      %c6 = arith.constant 6 : index
      %58 = memref.load %arg1[%c6] : memref<24xi32, #tpu.memory_space<smem>>
      %c0_i32_40 = arith.constant 0 : i32
      %c0_i32_41 = arith.constant 0 : i32
      %c0_i32_42 = arith.constant 0 : i32
      %59 = tpu.memref_slice %arg2[%58, %c0_i32_42] : memref<512x128xf32, #tpu.memory_space<any>> -> memref<1x128xf32, #tpu.memory_space<any>>
      %c6_i32 = arith.constant 6 : i32
      %c0_i32_43 = arith.constant 0 : i32
      %60 = tpu.memref_slice %arg4[%c0_i32_40, %c6_i32, %c0_i32_43] : memref<2x24x128xf32, #tpu.memory_space<vmem>> -> memref<1x1x128xf32, #tpu.memory_space<vmem>>
      %61 = tpu.memref_squeeze %60 : memref<1x1x128xf32, #tpu.memory_space<vmem>> -> memref<1x128xf32, #tpu.memory_space<vmem>>
      %62 = tpu.memref_slice %arg5[%c0_i32_41] : memref<2x!tpu.dma_semaphore, #tpu.memory_space<semaphore_mem>> -> memref<1x!tpu.dma_semaphore, #tpu.memory_space<semaphore_mem>>
      %63 = tpu.memref_squeeze %62 : memref<1x!tpu.dma_semaphore, #tpu.memory_space<semaphore_mem>> -> memref<!tpu.dma_semaphore, #tpu.memory_space<semaphore_mem>>
      tpu.enqueue_dma source(%59 : memref<1x128xf32, #tpu.memory_space<any>>) target(%61 : memref<1x128xf32, #tpu.memory_space<vmem>>) target_semaphore(%63 : memref<!tpu.dma_semaphore, #tpu.memory_space<semaphore_mem>>)
      %c7 = arith.constant 7 : index
      %64 = memref.load %arg1[%c7] : memref<24xi32, #tpu.memory_space<smem>>
      %c0_i32_44 = arith.constant 0 : i32
      %c0_i32_45 = arith.constant 0 : i32
      %c0_i32_46 = arith.constant 0 : i32
      %65 = tpu.memref_slice %arg2[%64, %c0_i32_46] : memref<512x128xf32, #tpu.memory_space<any>> -> memref<1x128xf32, #tpu.memory_space<any>>
      %c7_i32 = arith.constant 7 : i32
      %c0_i32_47 = arith.constant 0 : i32
      %66 = tpu.memref_slice %arg4[%c0_i32_44, %c7_i32, %c0_i32_47] : memref<2x24x128xf32, #tpu.memory_space<vmem>> -> memref<1x1x128xf32, #tpu.memory_space<vmem>>
      %67 = tpu.memref_squeeze %66 : memref<1x1x128xf32, #tpu.memory_space<vmem>> -> memref<1x128xf32, #tpu.memory_space<vmem>>
      %68 = tpu.memref_slice %arg5[%c0_i32_45] : memref<2x!tpu.dma_semaphore, #tpu.memory_space<semaphore_mem>> -> memref<1x!tpu.dma_semaphore, #tpu.memory_space<semaphore_mem>>
      %69 = tpu.memref_squeeze %68 : memref<1x!tpu.dma_semaphore, #tpu.memory_space<semaphore_mem>> -> memref<!tpu.dma_semaphore, #tpu.memory_space<semaphore_mem>>
      tpu.enqueue_dma source(%65 : memref<1x128xf32, #tpu.memory_space<any>>) target(%67 : memref<1x128xf32, #tpu.memory_space<vmem>>) target_semaphore(%69 : memref<!tpu.dma_semaphore, #tpu.memory_space<semaphore_mem>>)
      %c8 = arith.constant 8 : index
      %70 = memref.load %arg1[%c8] : memref<24xi32, #tpu.memory_space<smem>>
      %c0_i32_48 = arith.constant 0 : i32
      %c0_i32_49 = arith.constant 0 : i32
      %c0_i32_50 = arith.constant 0 : i32
      %71 = tpu.memref_slice %arg2[%70, %c0_i32_50] : memref<512x128xf32, #tpu.memory_space<any>> -> memref<1x128xf32, #tpu.memory_space<any>>
      %c8_i32 = arith.constant 8 : i32
      %c0_i32_51 = arith.constant 0 : i32
      %72 = tpu.memref_slice %arg4[%c0_i32_48, %c8_i32, %c0_i32_51] : memref<2x24x128xf32, #tpu.memory_space<vmem>> -> memref<1x1x128xf32, #tpu.memory_space<vmem>>
      %73 = tpu.memref_squeeze %72 : memref<1x1x128xf32, #tpu.memory_space<vmem>> -> memref<1x128xf32, #tpu.memory_space<vmem>>
      %74 = tpu.memref_slice %arg5[%c0_i32_49] : memref<2x!tpu.dma_semaphore, #tpu.memory_space<semaphore_mem>> -> memref<1x!tpu.dma_semaphore, #tpu.memory_space<semaphore_mem>>
      %75 = tpu.memref_squeeze %74 : memref<1x!tpu.dma_semaphore, #tpu.memory_space<semaphore_mem>> -> memref<!tpu.dma_semaphore, #tpu.memory_space<semaphore_mem>>
      tpu.enqueue_dma source(%71 : memref<1x128xf32, #tpu.memory_space<any>>) target(%73 : memref<1x128xf32, #tpu.memory_space<vmem>>) target_semaphore(%75 : memref<!tpu.dma_semaphore, #tpu.memory_space<semaphore_mem>>)
      %c9 = arith.constant 9 : index
      %76 = memref.load %arg1[%c9] : memref<24xi32, #tpu.memory_space<smem>>
      %c0_i32_52 = arith.constant 0 : i32
      %c0_i32_53 = arith.constant 0 : i32
      %c0_i32_54 = arith.constant 0 : i32
      %77 = tpu.memref_slice %arg2[%76, %c0_i32_54] : memref<512x128xf32, #tpu.memory_space<any>> -> memref<1x128xf32, #tpu.memory_space<any>>
      %c9_i32 = arith.constant 9 : i32
      %c0_i32_55 = arith.constant 0 : i32
      %78 = tpu.memref_slice %arg4[%c0_i32_52, %c9_i32, %c0_i32_55] : memref<2x24x128xf32, #tpu.memory_space<vmem>> -> memref<1x1x128xf32, #tpu.memory_space<vmem>>
      %79 = tpu.memref_squeeze %78 : memref<1x1x128xf32, #tpu.memory_space<vmem>> -> memref<1x128xf32, #tpu.memory_space<vmem>>
      %80 = tpu.memref_slice %arg5[%c0_i32_53] : memref<2x!tpu.dma_semaphore, #tpu.memory_space<semaphore_mem>> -> memref<1x!tpu.dma_semaphore, #tpu.memory_space<semaphore_mem>>
      %81 = tpu.memref_squeeze %80 : memref<1x!tpu.dma_semaphore, #tpu.memory_space<semaphore_mem>> -> memref<!tpu.dma_semaphore, #tpu.memory_space<semaphore_mem>>
      tpu.enqueue_dma source(%77 : memref<1x128xf32, #tpu.memory_space<any>>) target(%79 : memref<1x128xf32, #tpu.memory_space<vmem>>) target_semaphore(%81 : memref<!tpu.dma_semaphore, #tpu.memory_space<semaphore_mem>>)
      %c10 = arith.constant 10 : index
      %82 = memref.load %arg1[%c10] : memref<24xi32, #tpu.memory_space<smem>>
      %c0_i32_56 = arith.constant 0 : i32
      %c0_i32_57 = arith.constant 0 : i32
      %c0_i32_58 = arith.constant 0 : i32
      %83 = tpu.memref_slice %arg2[%82, %c0_i32_58] : memref<512x128xf32, #tpu.memory_space<any>> -> memref<1x128xf32, #tpu.memory_space<any>>
      %c10_i32 = arith.constant 10 : i32
      %c0_i32_59 = arith.constant 0 : i32
      %84 = tpu.memref_slice %arg4[%c0_i32_56, %c10_i32, %c0_i32_59] : memref<2x24x128xf32, #tpu.memory_space<vmem>> -> memref<1x1x128xf32, #tpu.memory_space<vmem>>
      %85 = tpu.memref_squeeze %84 : memref<1x1x128xf32, #tpu.memory_space<vmem>> -> memref<1x128xf32, #tpu.memory_space<vmem>>
      %86 = tpu.memref_slice %arg5[%c0_i32_57] : memref<2x!tpu.dma_semaphore, #tpu.memory_space<semaphore_mem>> -> memref<1x!tpu.dma_semaphore, #tpu.memory_space<semaphore_mem>>
      %87 = tpu.memref_squeeze %86 : memref<1x!tpu.dma_semaphore, #tpu.memory_space<semaphore_mem>> -> memref<!tpu.dma_semaphore, #tpu.memory_space<semaphore_mem>>
      tpu.enqueue_dma source(%83 : memref<1x128xf32, #tpu.memory_space<any>>) target(%85 : memref<1x128xf32, #tpu.memory_space<vmem>>) target_semaphore(%87 : memref<!tpu.dma_semaphore, #tpu.memory_space<semaphore_mem>>)
      %c11 = arith.constant 11 : index
      %88 = memref.load %arg1[%c11] : memref<24xi32, #tpu.memory_space<smem>>
      %c0_i32_60 = arith.constant 0 : i32
      %c0_i32_61 = arith.constant 0 : i32
      %c0_i32_62 = arith.constant 0 : i32
      %89 = tpu.memref_slice %arg2[%88, %c0_i32_62] : memref<512x128xf32, #tpu.memory_space<any>> -> memref<1x128xf32, #tpu.memory_space<any>>
      %c11_i32 = arith.constant 11 : i32
      %c0_i32_63 = arith.constant 0 : i32
      %90 = tpu.memref_slice %arg4[%c0_i32_60, %c11_i32, %c0_i32_63] : memref<2x24x128xf32, #tpu.memory_space<vmem>> -> memref<1x1x128xf32, #tpu.memory_space<vmem>>
      %91 = tpu.memref_squeeze %90 : memref<1x1x128xf32, #tpu.memory_space<vmem>> -> memref<1x128xf32, #tpu.memory_space<vmem>>
      %92 = tpu.memref_slice %arg5[%c0_i32_61] : memref<2x!tpu.dma_semaphore, #tpu.memory_space<semaphore_mem>> -> memref<1x!tpu.dma_semaphore, #tpu.memory_space<semaphore_mem>>
      %93 = tpu.memref_squeeze %92 : memref<1x!tpu.dma_semaphore, #tpu.memory_space<semaphore_mem>> -> memref<!tpu.dma_semaphore, #tpu.memory_space<semaphore_mem>>
      tpu.enqueue_dma source(%89 : memref<1x128xf32, #tpu.memory_space<any>>) target(%91 : memref<1x128xf32, #tpu.memory_space<vmem>>) target_semaphore(%93 : memref<!tpu.dma_semaphore, #tpu.memory_space<semaphore_mem>>)
      %c12 = arith.constant 12 : index
      %94 = memref.load %arg1[%c12] : memref<24xi32, #tpu.memory_space<smem>>
      %c0_i32_64 = arith.constant 0 : i32
      %c0_i32_65 = arith.constant 0 : i32
      %c0_i32_66 = arith.constant 0 : i32
      %95 = tpu.memref_slice %arg2[%94, %c0_i32_66] : memref<512x128xf32, #tpu.memory_space<any>> -> memref<1x128xf32, #tpu.memory_space<any>>
      %c12_i32 = arith.constant 12 : i32
      %c0_i32_67 = arith.constant 0 : i32
      %96 = tpu.memref_slice %arg4[%c0_i32_64, %c12_i32, %c0_i32_67] : memref<2x24x128xf32, #tpu.memory_space<vmem>> -> memref<1x1x128xf32, #tpu.memory_space<vmem>>
      %97 = tpu.memref_squeeze %96 : memref<1x1x128xf32, #tpu.memory_space<vmem>> -> memref<1x128xf32, #tpu.memory_space<vmem>>
      %98 = tpu.memref_slice %arg5[%c0_i32_65] : memref<2x!tpu.dma_semaphore, #tpu.memory_space<semaphore_mem>> -> memref<1x!tpu.dma_semaphore, #tpu.memory_space<semaphore_mem>>
      %99 = tpu.memref_squeeze %98 : memref<1x!tpu.dma_semaphore, #tpu.memory_space<semaphore_mem>> -> memref<!tpu.dma_semaphore, #tpu.memory_space<semaphore_mem>>
      tpu.enqueue_dma source(%95 : memref<1x128xf32, #tpu.memory_space<any>>) target(%97 : memref<1x128xf32, #tpu.memory_space<vmem>>) target_semaphore(%99 : memref<!tpu.dma_semaphore, #tpu.memory_space<semaphore_mem>>)
      %c13 = arith.constant 13 : index
      %100 = memref.load %arg1[%c13] : memref<24xi32, #tpu.memory_space<smem>>
      %c0_i32_68 = arith.constant 0 : i32
      %c0_i32_69 = arith.constant 0 : i32
      %c0_i32_70 = arith.constant 0 : i32
      %101 = tpu.memref_slice %arg2[%100, %c0_i32_70] : memref<512x128xf32, #tpu.memory_space<any>> -> memref<1x128xf32, #tpu.memory_space<any>>
      %c13_i32 = arith.constant 13 : i32
      %c0_i32_71 = arith.constant 0 : i32
      %102 = tpu.memref_slice %arg4[%c0_i32_68, %c13_i32, %c0_i32_71] : memref<2x24x128xf32, #tpu.memory_space<vmem>> -> memref<1x1x128xf32, #tpu.memory_space<vmem>>
      %103 = tpu.memref_squeeze %102 : memref<1x1x128xf32, #tpu.memory_space<vmem>> -> memref<1x128xf32, #tpu.memory_space<vmem>>
      %104 = tpu.memref_slice %arg5[%c0_i32_69] : memref<2x!tpu.dma_semaphore, #tpu.memory_space<semaphore_mem>> -> memref<1x!tpu.dma_semaphore, #tpu.memory_space<semaphore_mem>>
      %105 = tpu.memref_squeeze %104 : memref<1x!tpu.dma_semaphore, #tpu.memory_space<semaphore_mem>> -> memref<!tpu.dma_semaphore, #tpu.memory_space<semaphore_mem>>
      tpu.enqueue_dma source(%101 : memref<1x128xf32, #tpu.memory_space<any>>) target(%103 : memref<1x128xf32, #tpu.memory_space<vmem>>) target_semaphore(%105 : memref<!tpu.dma_semaphore, #tpu.memory_space<semaphore_mem>>)
      %c14 = arith.constant 14 : index
      %106 = memref.load %arg1[%c14] : memref<24xi32, #tpu.memory_space<smem>>
      %c0_i32_72 = arith.constant 0 : i32
      %c0_i32_73 = arith.constant 0 : i32
      %c0_i32_74 = arith.constant 0 : i32
      %107 = tpu.memref_slice %arg2[%106, %c0_i32_74] : memref<512x128xf32, #tpu.memory_space<any>> -> memref<1x128xf32, #tpu.memory_space<any>>
      %c14_i32 = arith.constant 14 : i32
      %c0_i32_75 = arith.constant 0 : i32
      %108 = tpu.memref_slice %arg4[%c0_i32_72, %c14_i32, %c0_i32_75] : memref<2x24x128xf32, #tpu.memory_space<vmem>> -> memref<1x1x128xf32, #tpu.memory_space<vmem>>
      %109 = tpu.memref_squeeze %108 : memref<1x1x128xf32, #tpu.memory_space<vmem>> -> memref<1x128xf32, #tpu.memory_space<vmem>>
      %110 = tpu.memref_slice %arg5[%c0_i32_73] : memref<2x!tpu.dma_semaphore, #tpu.memory_space<semaphore_mem>> -> memref<1x!tpu.dma_semaphore, #tpu.memory_space<semaphore_mem>>
      %111 = tpu.memref_squeeze %110 : memref<1x!tpu.dma_semaphore, #tpu.memory_space<semaphore_mem>> -> memref<!tpu.dma_semaphore, #tpu.memory_space<semaphore_mem>>
      tpu.enqueue_dma source(%107 : memref<1x128xf32, #tpu.memory_space<any>>) target(%109 : memref<1x128xf32, #tpu.memory_space<vmem>>) target_semaphore(%111 : memref<!tpu.dma_semaphore, #tpu.memory_space<semaphore_mem>>)
      %c15 = arith.constant 15 : index
      %112 = memref.load %arg1[%c15] : memref<24xi32, #tpu.memory_space<smem>>
      %c0_i32_76 = arith.constant 0 : i32
      %c0_i32_77 = arith.constant 0 : i32
      %c0_i32_78 = arith.constant 0 : i32
      %113 = tpu.memref_slice %arg2[%112, %c0_i32_78] : memref<512x128xf32, #tpu.memory_space<any>> -> memref<1x128xf32, #tpu.memory_space<any>>
      %c15_i32 = arith.constant 15 : i32
      %c0_i32_79 = arith.constant 0 : i32
      %114 = tpu.memref_slice %arg4[%c0_i32_76, %c15_i32, %c0_i32_79] : memref<2x24x128xf32, #tpu.memory_space<vmem>> -> memref<1x1x128xf32, #tpu.memory_space<vmem>>
      %115 = tpu.memref_squeeze %114 : memref<1x1x128xf32, #tpu.memory_space<vmem>> -> memref<1x128xf32, #tpu.memory_space<vmem>>
      %116 = tpu.memref_slice %arg5[%c0_i32_77] : memref<2x!tpu.dma_semaphore, #tpu.memory_space<semaphore_mem>> -> memref<1x!tpu.dma_semaphore, #tpu.memory_space<semaphore_mem>>
      %117 = tpu.memref_squeeze %116 : memref<1x!tpu.dma_semaphore, #tpu.memory_space<semaphore_mem>> -> memref<!tpu.dma_semaphore, #tpu.memory_space<semaphore_mem>>
      tpu.enqueue_dma source(%113 : memref<1x128xf32, #tpu.memory_space<any>>) target(%115 : memref<1x128xf32, #tpu.memory_space<vmem>>) target_semaphore(%117 : memref<!tpu.dma_semaphore, #tpu.memory_space<semaphore_mem>>)
      %c16 = arith.constant 16 : index
      %118 = memref.load %arg1[%c16] : memref<24xi32, #tpu.memory_space<smem>>
      %c0_i32_80 = arith.constant 0 : i32
      %c0_i32_81 = arith.constant 0 : i32
      %c0_i32_82 = arith.constant 0 : i32
      %119 = tpu.memref_slice %arg2[%118, %c0_i32_82] : memref<512x128xf32, #tpu.memory_space<any>> -> memref<1x128xf32, #tpu.memory_space<any>>
      %c16_i32 = arith.constant 16 : i32
      %c0_i32_83 = arith.constant 0 : i32
      %120 = tpu.memref_slice %arg4[%c0_i32_80, %c16_i32, %c0_i32_83] : memref<2x24x128xf32, #tpu.memory_space<vmem>> -> memref<1x1x128xf32, #tpu.memory_space<vmem>>
      %121 = tpu.memref_squeeze %120 : memref<1x1x128xf32, #tpu.memory_space<vmem>> -> memref<1x128xf32, #tpu.memory_space<vmem>>
      %122 = tpu.memref_slice %arg5[%c0_i32_81] : memref<2x!tpu.dma_semaphore, #tpu.memory_space<semaphore_mem>> -> memref<1x!tpu.dma_semaphore, #tpu.memory_space<semaphore_mem>>
      %123 = tpu.memref_squeeze %122 : memref<1x!tpu.dma_semaphore, #tpu.memory_space<semaphore_mem>> -> memref<!tpu.dma_semaphore, #tpu.memory_space<semaphore_mem>>
      tpu.enqueue_dma source(%119 : memref<1x128xf32, #tpu.memory_space<any>>) target(%121 : memref<1x128xf32, #tpu.memory_space<vmem>>) target_semaphore(%123 : memref<!tpu.dma_semaphore, #tpu.memory_space<semaphore_mem>>)
      %c17 = arith.constant 17 : index
      %124 = memref.load %arg1[%c17] : memref<24xi32, #tpu.memory_space<smem>>
      %c0_i32_84 = arith.constant 0 : i32
      %c0_i32_85 = arith.constant 0 : i32
      %c0_i32_86 = arith.constant 0 : i32
      %125 = tpu.memref_slice %arg2[%124, %c0_i32_86] : memref<512x128xf32, #tpu.memory_space<any>> -> memref<1x128xf32, #tpu.memory_space<any>>
      %c17_i32 = arith.constant 17 : i32
      %c0_i32_87 = arith.constant 0 : i32
      %126 = tpu.memref_slice %arg4[%c0_i32_84, %c17_i32, %c0_i32_87] : memref<2x24x128xf32, #tpu.memory_space<vmem>> -> memref<1x1x128xf32, #tpu.memory_space<vmem>>
      %127 = tpu.memref_squeeze %126 : memref<1x1x128xf32, #tpu.memory_space<vmem>> -> memref<1x128xf32, #tpu.memory_space<vmem>>
      %128 = tpu.memref_slice %arg5[%c0_i32_85] : memref<2x!tpu.dma_semaphore, #tpu.memory_space<semaphore_mem>> -> memref<1x!tpu.dma_semaphore, #tpu.memory_space<semaphore_mem>>
      %129 = tpu.memref_squeeze %128 : memref<1x!tpu.dma_semaphore, #tpu.memory_space<semaphore_mem>> -> memref<!tpu.dma_semaphore, #tpu.memory_space<semaphore_mem>>
      tpu.enqueue_dma source(%125 : memref<1x128xf32, #tpu.memory_space<any>>) target(%127 : memref<1x128xf32, #tpu.memory_space<vmem>>) target_semaphore(%129 : memref<!tpu.dma_semaphore, #tpu.memory_space<semaphore_mem>>)
      %c18 = arith.constant 18 : index
      %130 = memref.load %arg1[%c18] : memref<24xi32, #tpu.memory_space<smem>>
      %c0_i32_88 = arith.constant 0 : i32
      %c0_i32_89 = arith.constant 0 : i32
      %c0_i32_90 = arith.constant 0 : i32
      %131 = tpu.memref_slice %arg2[%130, %c0_i32_90] : memref<512x128xf32, #tpu.memory_space<any>> -> memref<1x128xf32, #tpu.memory_space<any>>
      %c18_i32 = arith.constant 18 : i32
      %c0_i32_91 = arith.constant 0 : i32
      %132 = tpu.memref_slice %arg4[%c0_i32_88, %c18_i32, %c0_i32_91] : memref<2x24x128xf32, #tpu.memory_space<vmem>> -> memref<1x1x128xf32, #tpu.memory_space<vmem>>
      %133 = tpu.memref_squeeze %132 : memref<1x1x128xf32, #tpu.memory_space<vmem>> -> memref<1x128xf32, #tpu.memory_space<vmem>>
      %134 = tpu.memref_slice %arg5[%c0_i32_89] : memref<2x!tpu.dma_semaphore, #tpu.memory_space<semaphore_mem>> -> memref<1x!tpu.dma_semaphore, #tpu.memory_space<semaphore_mem>>
      %135 = tpu.memref_squeeze %134 : memref<1x!tpu.dma_semaphore, #tpu.memory_space<semaphore_mem>> -> memref<!tpu.dma_semaphore, #tpu.memory_space<semaphore_mem>>
      tpu.enqueue_dma source(%131 : memref<1x128xf32, #tpu.memory_space<any>>) target(%133 : memref<1x128xf32, #tpu.memory_space<vmem>>) target_semaphore(%135 : memref<!tpu.dma_semaphore, #tpu.memory_space<semaphore_mem>>)
      %c19 = arith.constant 19 : index
      %136 = memref.load %arg1[%c19] : memref<24xi32, #tpu.memory_space<smem>>
      %c0_i32_92 = arith.constant 0 : i32
      %c0_i32_93 = arith.constant 0 : i32
      %c0_i32_94 = arith.constant 0 : i32
      %137 = tpu.memref_slice %arg2[%136, %c0_i32_94] : memref<512x128xf32, #tpu.memory_space<any>> -> memref<1x128xf32, #tpu.memory_space<any>>
      %c19_i32 = arith.constant 19 : i32
      %c0_i32_95 = arith.constant 0 : i32
      %138 = tpu.memref_slice %arg4[%c0_i32_92, %c19_i32, %c0_i32_95] : memref<2x24x128xf32, #tpu.memory_space<vmem>> -> memref<1x1x128xf32, #tpu.memory_space<vmem>>
      %139 = tpu.memref_squeeze %138 : memref<1x1x128xf32, #tpu.memory_space<vmem>> -> memref<1x128xf32, #tpu.memory_space<vmem>>
      %140 = tpu.memref_slice %arg5[%c0_i32_93] : memref<2x!tpu.dma_semaphore, #tpu.memory_space<semaphore_mem>> -> memref<1x!tpu.dma_semaphore, #tpu.memory_space<semaphore_mem>>
      %141 = tpu.memref_squeeze %140 : memref<1x!tpu.dma_semaphore, #tpu.memory_space<semaphore_mem>> -> memref<!tpu.dma_semaphore, #tpu.memory_space<semaphore_mem>>
      tpu.enqueue_dma source(%137 : memref<1x128xf32, #tpu.memory_space<any>>) target(%139 : memref<1x128xf32, #tpu.memory_space<vmem>>) target_semaphore(%141 : memref<!tpu.dma_semaphore, #tpu.memory_space<semaphore_mem>>)
      %c20 = arith.constant 20 : index
      %142 = memref.load %arg1[%c20] : memref<24xi32, #tpu.memory_space<smem>>
      %c0_i32_96 = arith.constant 0 : i32
      %c0_i32_97 = arith.constant 0 : i32
      %c0_i32_98 = arith.constant 0 : i32
      %143 = tpu.memref_slice %arg2[%142, %c0_i32_98] : memref<512x128xf32, #tpu.memory_space<any>> -> memref<1x128xf32, #tpu.memory_space<any>>
      %c20_i32 = arith.constant 20 : i32
      %c0_i32_99 = arith.constant 0 : i32
      %144 = tpu.memref_slice %arg4[%c0_i32_96, %c20_i32, %c0_i32_99] : memref<2x24x128xf32, #tpu.memory_space<vmem>> -> memref<1x1x128xf32, #tpu.memory_space<vmem>>
      %145 = tpu.memref_squeeze %144 : memref<1x1x128xf32, #tpu.memory_space<vmem>> -> memref<1x128xf32, #tpu.memory_space<vmem>>
      %146 = tpu.memref_slice %arg5[%c0_i32_97] : memref<2x!tpu.dma_semaphore, #tpu.memory_space<semaphore_mem>> -> memref<1x!tpu.dma_semaphore, #tpu.memory_space<semaphore_mem>>
      %147 = tpu.memref_squeeze %146 : memref<1x!tpu.dma_semaphore, #tpu.memory_space<semaphore_mem>> -> memref<!tpu.dma_semaphore, #tpu.memory_space<semaphore_mem>>
      tpu.enqueue_dma source(%143 : memref<1x128xf32, #tpu.memory_space<any>>) target(%145 : memref<1x128xf32, #tpu.memory_space<vmem>>) target_semaphore(%147 : memref<!tpu.dma_semaphore, #tpu.memory_space<semaphore_mem>>)
      %c21 = arith.constant 21 : index
      %148 = memref.load %arg1[%c21] : memref<24xi32, #tpu.memory_space<smem>>
      %c0_i32_100 = arith.constant 0 : i32
      %c0_i32_101 = arith.constant 0 : i32
      %c0_i32_102 = arith.constant 0 : i32
      %149 = tpu.memref_slice %arg2[%148, %c0_i32_102] : memref<512x128xf32, #tpu.memory_space<any>> -> memref<1x128xf32, #tpu.memory_space<any>>
      %c21_i32 = arith.constant 21 : i32
      %c0_i32_103 = arith.constant 0 : i32
      %150 = tpu.memref_slice %arg4[%c0_i32_100, %c21_i32, %c0_i32_103] : memref<2x24x128xf32, #tpu.memory_space<vmem>> -> memref<1x1x128xf32, #tpu.memory_space<vmem>>
      %151 = tpu.memref_squeeze %150 : memref<1x1x128xf32, #tpu.memory_space<vmem>> -> memref<1x128xf32, #tpu.memory_space<vmem>>
      %152 = tpu.memref_slice %arg5[%c0_i32_101] : memref<2x!tpu.dma_semaphore, #tpu.memory_space<semaphore_mem>> -> memref<1x!tpu.dma_semaphore, #tpu.memory_space<semaphore_mem>>
      %153 = tpu.memref_squeeze %152 : memref<1x!tpu.dma_semaphore, #tpu.memory_space<semaphore_mem>> -> memref<!tpu.dma_semaphore, #tpu.memory_space<semaphore_mem>>
      tpu.enqueue_dma source(%149 : memref<1x128xf32, #tpu.memory_space<any>>) target(%151 : memref<1x128xf32, #tpu.memory_space<vmem>>) target_semaphore(%153 : memref<!tpu.dma_semaphore, #tpu.memory_space<semaphore_mem>>)
      %c22 = arith.constant 22 : index
      %154 = memref.load %arg1[%c22] : memref<24xi32, #tpu.memory_space<smem>>
      %c0_i32_104 = arith.constant 0 : i32
      %c0_i32_105 = arith.constant 0 : i32
      %c0_i32_106 = arith.constant 0 : i32
      %155 = tpu.memref_slice %arg2[%154, %c0_i32_106] : memref<512x128xf32, #tpu.memory_space<any>> -> memref<1x128xf32, #tpu.memory_space<any>>
      %c22_i32 = arith.constant 22 : i32
      %c0_i32_107 = arith.constant 0 : i32
      %156 = tpu.memref_slice %arg4[%c0_i32_104, %c22_i32, %c0_i32_107] : memref<2x24x128xf32, #tpu.memory_space<vmem>> -> memref<1x1x128xf32, #tpu.memory_space<vmem>>
      %157 = tpu.memref_squeeze %156 : memref<1x1x128xf32, #tpu.memory_space<vmem>> -> memref<1x128xf32, #tpu.memory_space<vmem>>
      %158 = tpu.memref_slice %arg5[%c0_i32_105] : memref<2x!tpu.dma_semaphore, #tpu.memory_space<semaphore_mem>> -> memref<1x!tpu.dma_semaphore, #tpu.memory_space<semaphore_mem>>
      %159 = tpu.memref_squeeze %158 : memref<1x!tpu.dma_semaphore, #tpu.memory_space<semaphore_mem>> -> memref<!tpu.dma_semaphore, #tpu.memory_space<semaphore_mem>>
      tpu.enqueue_dma source(%155 : memref<1x128xf32, #tpu.memory_space<any>>) target(%157 : memref<1x128xf32, #tpu.memory_space<vmem>>) target_semaphore(%159 : memref<!tpu.dma_semaphore, #tpu.memory_space<semaphore_mem>>)
      %c23 = arith.constant 23 : index
      %160 = memref.load %arg1[%c23] : memref<24xi32, #tpu.memory_space<smem>>
      %c0_i32_108 = arith.constant 0 : i32
      %c0_i32_109 = arith.constant 0 : i32
      %c0_i32_110 = arith.constant 0 : i32
      %161 = tpu.memref_slice %arg2[%160, %c0_i32_110] : memref<512x128xf32, #tpu.memory_space<any>> -> memref<1x128xf32, #tpu.memory_space<any>>
      %c23_i32 = arith.constant 23 : i32
      %c0_i32_111 = arith.constant 0 : i32
      %162 = tpu.memref_slice %arg4[%c0_i32_108, %c23_i32, %c0_i32_111] : memref<2x24x128xf32, #tpu.memory_space<vmem>> -> memref<1x1x128xf32, #tpu.memory_space<vmem>>
      %163 = tpu.memref_squeeze %162 : memref<1x1x128xf32, #tpu.memory_space<vmem>> -> memref<1x128xf32, #tpu.memory_space<vmem>>
      %164 = tpu.memref_slice %arg5[%c0_i32_109] : memref<2x!tpu.dma_semaphore, #tpu.memory_space<semaphore_mem>> -> memref<1x!tpu.dma_semaphore, #tpu.memory_space<semaphore_mem>>
      %165 = tpu.memref_squeeze %164 : memref<1x!tpu.dma_semaphore, #tpu.memory_space<semaphore_mem>> -> memref<!tpu.dma_semaphore, #tpu.memory_space<semaphore_mem>>
      tpu.enqueue_dma source(%161 : memref<1x128xf32, #tpu.memory_space<any>>) target(%163 : memref<1x128xf32, #tpu.memory_space<vmem>>) target_semaphore(%165 : memref<!tpu.dma_semaphore, #tpu.memory_space<semaphore_mem>>)
    } else {
    }
    %c1_i32_3 = arith.constant 1 : i32
    %6 = arith.addi %arg0, %c1_i32_3 : i32
    %c1_i32_4 = arith.constant 1 : i32
    %7 = arith.cmpi slt, %6, %c1_i32_4 : i32
    %8 = arith.extui %7 : i1 to i32
    %c0_i32_5 = arith.constant 0 : i32
    %9 = arith.cmpi ne, %8, %c0_i32_5 : i32
    scf.if %9 {
      %c1_i32_13 = arith.constant 1 : i32
      %22 = arith.addi %arg0, %c1_i32_13 : i32
      %c24_i32 = arith.constant 24 : i32
      %23 = arith.muli %22, %c24_i32 : i32
      %c0_i32_14 = arith.constant 0 : i32
      %24 = arith.addi %23, %c0_i32_14 : i32
      %25 = arith.index_cast %24 : i32 to index
      %26 = memref.load %arg1[%25] : memref<24xi32, #tpu.memory_space<smem>>
      %c0_i32_15 = arith.constant 0 : i32
      %27 = tpu.memref_slice %arg2[%26, %c0_i32_15] : memref<512x128xf32, #tpu.memory_space<any>> -> memref<1x128xf32, #tpu.memory_space<any>>
      %c0_i32_16 = arith.constant 0 : i32
      %c0_i32_17 = arith.constant 0 : i32
      %28 = tpu.memref_slice %arg4[%2, %c0_i32_16, %c0_i32_17] : memref<2x24x128xf32, #tpu.memory_space<vmem>> -> memref<1x1x128xf32, #tpu.memory_space<vmem>>
      %29 = tpu.memref_squeeze %28 : memref<1x1x128xf32, #tpu.memory_space<vmem>> -> memref<1x128xf32, #tpu.memory_space<vmem>>
      %30 = tpu.memref_slice %arg5[%2] : memref<2x!tpu.dma_semaphore, #tpu.memory_space<semaphore_mem>> -> memref<1x!tpu.dma_semaphore, #tpu.memory_space<semaphore_mem>>
      %31 = tpu.memref_squeeze %30 : memref<1x!tpu.dma_semaphore, #tpu.memory_space<semaphore_mem>> -> memref<!tpu.dma_semaphore, #tpu.memory_space<semaphore_mem>>
      tpu.enqueue_dma source(%27 : memref<1x128xf32, #tpu.memory_space<any>>) target(%29 : memref<1x128xf32, #tpu.memory_space<vmem>>) target_semaphore(%31 : memref<!tpu.dma_semaphore, #tpu.memory_space<semaphore_mem>>)
      %c1_i32_18 = arith.constant 1 : i32
      %32 = arith.addi %23, %c1_i32_18 : i32
      %33 = arith.index_cast %32 : i32 to index
      %34 = memref.load %arg1[%33] : memref<24xi32, #tpu.memory_space<smem>>
      %c0_i32_19 = arith.constant 0 : i32
      %35 = tpu.memref_slice %arg2[%34, %c0_i32_19] : memref<512x128xf32, #tpu.memory_space<any>> -> memref<1x128xf32, #tpu.memory_space<any>>
      %c1_i32_20 = arith.constant 1 : i32
      %c0_i32_21 = arith.constant 0 : i32
      %36 = tpu.memref_slice %arg4[%2, %c1_i32_20, %c0_i32_21] : memref<2x24x128xf32, #tpu.memory_space<vmem>> -> memref<1x1x128xf32, #tpu.memory_space<vmem>>
      %37 = tpu.memref_squeeze %36 : memref<1x1x128xf32, #tpu.memory_space<vmem>> -> memref<1x128xf32, #tpu.memory_space<vmem>>
      %38 = tpu.memref_slice %arg5[%2] : memref<2x!tpu.dma_semaphore, #tpu.memory_space<semaphore_mem>> -> memref<1x!tpu.dma_semaphore, #tpu.memory_space<semaphore_mem>>
      %39 = tpu.memref_squeeze %38 : memref<1x!tpu.dma_semaphore, #tpu.memory_space<semaphore_mem>> -> memref<!tpu.dma_semaphore, #tpu.memory_space<semaphore_mem>>
      tpu.enqueue_dma source(%35 : memref<1x128xf32, #tpu.memory_space<any>>) target(%37 : memref<1x128xf32, #tpu.memory_space<vmem>>) target_semaphore(%39 : memref<!tpu.dma_semaphore, #tpu.memory_space<semaphore_mem>>)
      %c2_i32 = arith.constant 2 : i32
      %40 = arith.addi %23, %c2_i32 : i32
      %41 = arith.index_cast %40 : i32 to index
      %42 = memref.load %arg1[%41] : memref<24xi32, #tpu.memory_space<smem>>
      %c0_i32_22 = arith.constant 0 : i32
      %43 = tpu.memref_slice %arg2[%42, %c0_i32_22] : memref<512x128xf32, #tpu.memory_space<any>> -> memref<1x128xf32, #tpu.memory_space<any>>
      %c2_i32_23 = arith.constant 2 : i32
      %c0_i32_24 = arith.constant 0 : i32
      %44 = tpu.memref_slice %arg4[%2, %c2_i32_23, %c0_i32_24] : memref<2x24x128xf32, #tpu.memory_space<vmem>> -> memref<1x1x128xf32, #tpu.memory_space<vmem>>
      %45 = tpu.memref_squeeze %44 : memref<1x1x128xf32, #tpu.memory_space<vmem>> -> memref<1x128xf32, #tpu.memory_space<vmem>>
      %46 = tpu.memref_slice %arg5[%2] : memref<2x!tpu.dma_semaphore, #tpu.memory_space<semaphore_mem>> -> memref<1x!tpu.dma_semaphore, #tpu.memory_space<semaphore_mem>>
      %47 = tpu.memref_squeeze %46 : memref<1x!tpu.dma_semaphore, #tpu.memory_space<semaphore_mem>> -> memref<!tpu.dma_semaphore, #tpu.memory_space<semaphore_mem>>
      tpu.enqueue_dma source(%43 : memref<1x128xf32, #tpu.memory_space<any>>) target(%45 : memref<1x128xf32, #tpu.memory_space<vmem>>) target_semaphore(%47 : memref<!tpu.dma_semaphore, #tpu.memory_space<semaphore_mem>>)
      %c3_i32 = arith.constant 3 : i32
      %48 = arith.addi %23, %c3_i32 : i32
      %49 = arith.index_cast %48 : i32 to index
      %50 = memref.load %arg1[%49] : memref<24xi32, #tpu.memory_space<smem>>
      %c0_i32_25 = arith.constant 0 : i32
      %51 = tpu.memref_slice %arg2[%50, %c0_i32_25] : memref<512x128xf32, #tpu.memory_space<any>> -> memref<1x128xf32, #tpu.memory_space<any>>
      %c3_i32_26 = arith.constant 3 : i32
      %c0_i32_27 = arith.constant 0 : i32
      %52 = tpu.memref_slice %arg4[%2, %c3_i32_26, %c0_i32_27] : memref<2x24x128xf32, #tpu.memory_space<vmem>> -> memref<1x1x128xf32, #tpu.memory_space<vmem>>
      %53 = tpu.memref_squeeze %52 : memref<1x1x128xf32, #tpu.memory_space<vmem>> -> memref<1x128xf32, #tpu.memory_space<vmem>>
      %54 = tpu.memref_slice %arg5[%2] : memref<2x!tpu.dma_semaphore, #tpu.memory_space<semaphore_mem>> -> memref<1x!tpu.dma_semaphore, #tpu.memory_space<semaphore_mem>>
      %55 = tpu.memref_squeeze %54 : memref<1x!tpu.dma_semaphore, #tpu.memory_space<semaphore_mem>> -> memref<!tpu.dma_semaphore, #tpu.memory_space<semaphore_mem>>
      tpu.enqueue_dma source(%51 : memref<1x128xf32, #tpu.memory_space<any>>) target(%53 : memref<1x128xf32, #tpu.memory_space<vmem>>) target_semaphore(%55 : memref<!tpu.dma_semaphore, #tpu.memory_space<semaphore_mem>>)
      %c4_i32 = arith.constant 4 : i32
      %56 = arith.addi %23, %c4_i32 : i32
      %57 = arith.index_cast %56 : i32 to index
      %58 = memref.load %arg1[%57] : memref<24xi32, #tpu.memory_space<smem>>
      %c0_i32_28 = arith.constant 0 : i32
      %59 = tpu.memref_slice %arg2[%58, %c0_i32_28] : memref<512x128xf32, #tpu.memory_space<any>> -> memref<1x128xf32, #tpu.memory_space<any>>
      %c4_i32_29 = arith.constant 4 : i32
      %c0_i32_30 = arith.constant 0 : i32
      %60 = tpu.memref_slice %arg4[%2, %c4_i32_29, %c0_i32_30] : memref<2x24x128xf32, #tpu.memory_space<vmem>> -> memref<1x1x128xf32, #tpu.memory_space<vmem>>
      %61 = tpu.memref_squeeze %60 : memref<1x1x128xf32, #tpu.memory_space<vmem>> -> memref<1x128xf32, #tpu.memory_space<vmem>>
      %62 = tpu.memref_slice %arg5[%2] : memref<2x!tpu.dma_semaphore, #tpu.memory_space<semaphore_mem>> -> memref<1x!tpu.dma_semaphore, #tpu.memory_space<semaphore_mem>>
      %63 = tpu.memref_squeeze %62 : memref<1x!tpu.dma_semaphore, #tpu.memory_space<semaphore_mem>> -> memref<!tpu.dma_semaphore, #tpu.memory_space<semaphore_mem>>
      tpu.enqueue_dma source(%59 : memref<1x128xf32, #tpu.memory_space<any>>) target(%61 : memref<1x128xf32, #tpu.memory_space<vmem>>) target_semaphore(%63 : memref<!tpu.dma_semaphore, #tpu.memory_space<semaphore_mem>>)
      %c5_i32 = arith.constant 5 : i32
      %64 = arith.addi %23, %c5_i32 : i32
      %65 = arith.index_cast %64 : i32 to index
      %66 = memref.load %arg1[%65] : memref<24xi32, #tpu.memory_space<smem>>
      %c0_i32_31 = arith.constant 0 : i32
      %67 = tpu.memref_slice %arg2[%66, %c0_i32_31] : memref<512x128xf32, #tpu.memory_space<any>> -> memref<1x128xf32, #tpu.memory_space<any>>
      %c5_i32_32 = arith.constant 5 : i32
      %c0_i32_33 = arith.constant 0 : i32
      %68 = tpu.memref_slice %arg4[%2, %c5_i32_32, %c0_i32_33] : memref<2x24x128xf32, #tpu.memory_space<vmem>> -> memref<1x1x128xf32, #tpu.memory_space<vmem>>
      %69 = tpu.memref_squeeze %68 : memref<1x1x128xf32, #tpu.memory_space<vmem>> -> memref<1x128xf32, #tpu.memory_space<vmem>>
      %70 = tpu.memref_slice %arg5[%2] : memref<2x!tpu.dma_semaphore, #tpu.memory_space<semaphore_mem>> -> memref<1x!tpu.dma_semaphore, #tpu.memory_space<semaphore_mem>>
      %71 = tpu.memref_squeeze %70 : memref<1x!tpu.dma_semaphore, #tpu.memory_space<semaphore_mem>> -> memref<!tpu.dma_semaphore, #tpu.memory_space<semaphore_mem>>
      tpu.enqueue_dma source(%67 : memref<1x128xf32, #tpu.memory_space<any>>) target(%69 : memref<1x128xf32, #tpu.memory_space<vmem>>) target_semaphore(%71 : memref<!tpu.dma_semaphore, #tpu.memory_space<semaphore_mem>>)
      %c6_i32 = arith.constant 6 : i32
      %72 = arith.addi %23, %c6_i32 : i32
      %73 = arith.index_cast %72 : i32 to index
      %74 = memref.load %arg1[%73] : memref<24xi32, #tpu.memory_space<smem>>
      %c0_i32_34 = arith.constant 0 : i32
      %75 = tpu.memref_slice %arg2[%74, %c0_i32_34] : memref<512x128xf32, #tpu.memory_space<any>> -> memref<1x128xf32, #tpu.memory_space<any>>
      %c6_i32_35 = arith.constant 6 : i32
      %c0_i32_36 = arith.constant 0 : i32
      %76 = tpu.memref_slice %arg4[%2, %c6_i32_35, %c0_i32_36] : memref<2x24x128xf32, #tpu.memory_space<vmem>> -> memref<1x1x128xf32, #tpu.memory_space<vmem>>
      %77 = tpu.memref_squeeze %76 : memref<1x1x128xf32, #tpu.memory_space<vmem>> -> memref<1x128xf32, #tpu.memory_space<vmem>>
      %78 = tpu.memref_slice %arg5[%2] : memref<2x!tpu.dma_semaphore, #tpu.memory_space<semaphore_mem>> -> memref<1x!tpu.dma_semaphore, #tpu.memory_space<semaphore_mem>>
      %79 = tpu.memref_squeeze %78 : memref<1x!tpu.dma_semaphore, #tpu.memory_space<semaphore_mem>> -> memref<!tpu.dma_semaphore, #tpu.memory_space<semaphore_mem>>
      tpu.enqueue_dma source(%75 : memref<1x128xf32, #tpu.memory_space<any>>) target(%77 : memref<1x128xf32, #tpu.memory_space<vmem>>) target_semaphore(%79 : memref<!tpu.dma_semaphore, #tpu.memory_space<semaphore_mem>>)
      %c7_i32 = arith.constant 7 : i32
      %80 = arith.addi %23, %c7_i32 : i32
      %81 = arith.index_cast %80 : i32 to index
      %82 = memref.load %arg1[%81] : memref<24xi32, #tpu.memory_space<smem>>
      %c0_i32_37 = arith.constant 0 : i32
      %83 = tpu.memref_slice %arg2[%82, %c0_i32_37] : memref<512x128xf32, #tpu.memory_space<any>> -> memref<1x128xf32, #tpu.memory_space<any>>
      %c7_i32_38 = arith.constant 7 : i32
      %c0_i32_39 = arith.constant 0 : i32
      %84 = tpu.memref_slice %arg4[%2, %c7_i32_38, %c0_i32_39] : memref<2x24x128xf32, #tpu.memory_space<vmem>> -> memref<1x1x128xf32, #tpu.memory_space<vmem>>
      %85 = tpu.memref_squeeze %84 : memref<1x1x128xf32, #tpu.memory_space<vmem>> -> memref<1x128xf32, #tpu.memory_space<vmem>>
      %86 = tpu.memref_slice %arg5[%2] : memref<2x!tpu.dma_semaphore, #tpu.memory_space<semaphore_mem>> -> memref<1x!tpu.dma_semaphore, #tpu.memory_space<semaphore_mem>>
      %87 = tpu.memref_squeeze %86 : memref<1x!tpu.dma_semaphore, #tpu.memory_space<semaphore_mem>> -> memref<!tpu.dma_semaphore, #tpu.memory_space<semaphore_mem>>
      tpu.enqueue_dma source(%83 : memref<1x128xf32, #tpu.memory_space<any>>) target(%85 : memref<1x128xf32, #tpu.memory_space<vmem>>) target_semaphore(%87 : memref<!tpu.dma_semaphore, #tpu.memory_space<semaphore_mem>>)
      %c8_i32 = arith.constant 8 : i32
      %88 = arith.addi %23, %c8_i32 : i32
      %89 = arith.index_cast %88 : i32 to index
      %90 = memref.load %arg1[%89] : memref<24xi32, #tpu.memory_space<smem>>
      %c0_i32_40 = arith.constant 0 : i32
      %91 = tpu.memref_slice %arg2[%90, %c0_i32_40] : memref<512x128xf32, #tpu.memory_space<any>> -> memref<1x128xf32, #tpu.memory_space<any>>
      %c8_i32_41 = arith.constant 8 : i32
      %c0_i32_42 = arith.constant 0 : i32
      %92 = tpu.memref_slice %arg4[%2, %c8_i32_41, %c0_i32_42] : memref<2x24x128xf32, #tpu.memory_space<vmem>> -> memref<1x1x128xf32, #tpu.memory_space<vmem>>
      %93 = tpu.memref_squeeze %92 : memref<1x1x128xf32, #tpu.memory_space<vmem>> -> memref<1x128xf32, #tpu.memory_space<vmem>>
      %94 = tpu.memref_slice %arg5[%2] : memref<2x!tpu.dma_semaphore, #tpu.memory_space<semaphore_mem>> -> memref<1x!tpu.dma_semaphore, #tpu.memory_space<semaphore_mem>>
      %95 = tpu.memref_squeeze %94 : memref<1x!tpu.dma_semaphore, #tpu.memory_space<semaphore_mem>> -> memref<!tpu.dma_semaphore, #tpu.memory_space<semaphore_mem>>
      tpu.enqueue_dma source(%91 : memref<1x128xf32, #tpu.memory_space<any>>) target(%93 : memref<1x128xf32, #tpu.memory_space<vmem>>) target_semaphore(%95 : memref<!tpu.dma_semaphore, #tpu.memory_space<semaphore_mem>>)
      %c9_i32 = arith.constant 9 : i32
      %96 = arith.addi %23, %c9_i32 : i32
      %97 = arith.index_cast %96 : i32 to index
      %98 = memref.load %arg1[%97] : memref<24xi32, #tpu.memory_space<smem>>
      %c0_i32_43 = arith.constant 0 : i32
      %99 = tpu.memref_slice %arg2[%98, %c0_i32_43] : memref<512x128xf32, #tpu.memory_space<any>> -> memref<1x128xf32, #tpu.memory_space<any>>
      %c9_i32_44 = arith.constant 9 : i32
      %c0_i32_45 = arith.constant 0 : i32
      %100 = tpu.memref_slice %arg4[%2, %c9_i32_44, %c0_i32_45] : memref<2x24x128xf32, #tpu.memory_space<vmem>> -> memref<1x1x128xf32, #tpu.memory_space<vmem>>
      %101 = tpu.memref_squeeze %100 : memref<1x1x128xf32, #tpu.memory_space<vmem>> -> memref<1x128xf32, #tpu.memory_space<vmem>>
      %102 = tpu.memref_slice %arg5[%2] : memref<2x!tpu.dma_semaphore, #tpu.memory_space<semaphore_mem>> -> memref<1x!tpu.dma_semaphore, #tpu.memory_space<semaphore_mem>>
      %103 = tpu.memref_squeeze %102 : memref<1x!tpu.dma_semaphore, #tpu.memory_space<semaphore_mem>> -> memref<!tpu.dma_semaphore, #tpu.memory_space<semaphore_mem>>
      tpu.enqueue_dma source(%99 : memref<1x128xf32, #tpu.memory_space<any>>) target(%101 : memref<1x128xf32, #tpu.memory_space<vmem>>) target_semaphore(%103 : memref<!tpu.dma_semaphore, #tpu.memory_space<semaphore_mem>>)
      %c10_i32 = arith.constant 10 : i32
      %104 = arith.addi %23, %c10_i32 : i32
      %105 = arith.index_cast %104 : i32 to index
      %106 = memref.load %arg1[%105] : memref<24xi32, #tpu.memory_space<smem>>
      %c0_i32_46 = arith.constant 0 : i32
      %107 = tpu.memref_slice %arg2[%106, %c0_i32_46] : memref<512x128xf32, #tpu.memory_space<any>> -> memref<1x128xf32, #tpu.memory_space<any>>
      %c10_i32_47 = arith.constant 10 : i32
      %c0_i32_48 = arith.constant 0 : i32
      %108 = tpu.memref_slice %arg4[%2, %c10_i32_47, %c0_i32_48] : memref<2x24x128xf32, #tpu.memory_space<vmem>> -> memref<1x1x128xf32, #tpu.memory_space<vmem>>
      %109 = tpu.memref_squeeze %108 : memref<1x1x128xf32, #tpu.memory_space<vmem>> -> memref<1x128xf32, #tpu.memory_space<vmem>>
      %110 = tpu.memref_slice %arg5[%2] : memref<2x!tpu.dma_semaphore, #tpu.memory_space<semaphore_mem>> -> memref<1x!tpu.dma_semaphore, #tpu.memory_space<semaphore_mem>>
      %111 = tpu.memref_squeeze %110 : memref<1x!tpu.dma_semaphore, #tpu.memory_space<semaphore_mem>> -> memref<!tpu.dma_semaphore, #tpu.memory_space<semaphore_mem>>
      tpu.enqueue_dma source(%107 : memref<1x128xf32, #tpu.memory_space<any>>) target(%109 : memref<1x128xf32, #tpu.memory_space<vmem>>) target_semaphore(%111 : memref<!tpu.dma_semaphore, #tpu.memory_space<semaphore_mem>>)
      %c11_i32 = arith.constant 11 : i32
      %112 = arith.addi %23, %c11_i32 : i32
      %113 = arith.index_cast %112 : i32 to index
      %114 = memref.load %arg1[%113] : memref<24xi32, #tpu.memory_space<smem>>
      %c0_i32_49 = arith.constant 0 : i32
      %115 = tpu.memref_slice %arg2[%114, %c0_i32_49] : memref<512x128xf32, #tpu.memory_space<any>> -> memref<1x128xf32, #tpu.memory_space<any>>
      %c11_i32_50 = arith.constant 11 : i32
      %c0_i32_51 = arith.constant 0 : i32
      %116 = tpu.memref_slice %arg4[%2, %c11_i32_50, %c0_i32_51] : memref<2x24x128xf32, #tpu.memory_space<vmem>> -> memref<1x1x128xf32, #tpu.memory_space<vmem>>
      %117 = tpu.memref_squeeze %116 : memref<1x1x128xf32, #tpu.memory_space<vmem>> -> memref<1x128xf32, #tpu.memory_space<vmem>>
      %118 = tpu.memref_slice %arg5[%2] : memref<2x!tpu.dma_semaphore, #tpu.memory_space<semaphore_mem>> -> memref<1x!tpu.dma_semaphore, #tpu.memory_space<semaphore_mem>>
      %119 = tpu.memref_squeeze %118 : memref<1x!tpu.dma_semaphore, #tpu.memory_space<semaphore_mem>> -> memref<!tpu.dma_semaphore, #tpu.memory_space<semaphore_mem>>
      tpu.enqueue_dma source(%115 : memref<1x128xf32, #tpu.memory_space<any>>) target(%117 : memref<1x128xf32, #tpu.memory_space<vmem>>) target_semaphore(%119 : memref<!tpu.dma_semaphore, #tpu.memory_space<semaphore_mem>>)
      %c12_i32 = arith.constant 12 : i32
      %120 = arith.addi %23, %c12_i32 : i32
      %121 = arith.index_cast %120 : i32 to index
      %122 = memref.load %arg1[%121] : memref<24xi32, #tpu.memory_space<smem>>
      %c0_i32_52 = arith.constant 0 : i32
      %123 = tpu.memref_slice %arg2[%122, %c0_i32_52] : memref<512x128xf32, #tpu.memory_space<any>> -> memref<1x128xf32, #tpu.memory_space<any>>
      %c12_i32_53 = arith.constant 12 : i32
      %c0_i32_54 = arith.constant 0 : i32
      %124 = tpu.memref_slice %arg4[%2, %c12_i32_53, %c0_i32_54] : memref<2x24x128xf32, #tpu.memory_space<vmem>> -> memref<1x1x128xf32, #tpu.memory_space<vmem>>
      %125 = tpu.memref_squeeze %124 : memref<1x1x128xf32, #tpu.memory_space<vmem>> -> memref<1x128xf32, #tpu.memory_space<vmem>>
      %126 = tpu.memref_slice %arg5[%2] : memref<2x!tpu.dma_semaphore, #tpu.memory_space<semaphore_mem>> -> memref<1x!tpu.dma_semaphore, #tpu.memory_space<semaphore_mem>>
      %127 = tpu.memref_squeeze %126 : memref<1x!tpu.dma_semaphore, #tpu.memory_space<semaphore_mem>> -> memref<!tpu.dma_semaphore, #tpu.memory_space<semaphore_mem>>
      tpu.enqueue_dma source(%123 : memref<1x128xf32, #tpu.memory_space<any>>) target(%125 : memref<1x128xf32, #tpu.memory_space<vmem>>) target_semaphore(%127 : memref<!tpu.dma_semaphore, #tpu.memory_space<semaphore_mem>>)
      %c13_i32 = arith.constant 13 : i32
      %128 = arith.addi %23, %c13_i32 : i32
      %129 = arith.index_cast %128 : i32 to index
      %130 = memref.load %arg1[%129] : memref<24xi32, #tpu.memory_space<smem>>
      %c0_i32_55 = arith.constant 0 : i32
      %131 = tpu.memref_slice %arg2[%130, %c0_i32_55] : memref<512x128xf32, #tpu.memory_space<any>> -> memref<1x128xf32, #tpu.memory_space<any>>
      %c13_i32_56 = arith.constant 13 : i32
      %c0_i32_57 = arith.constant 0 : i32
      %132 = tpu.memref_slice %arg4[%2, %c13_i32_56, %c0_i32_57] : memref<2x24x128xf32, #tpu.memory_space<vmem>> -> memref<1x1x128xf32, #tpu.memory_space<vmem>>
      %133 = tpu.memref_squeeze %132 : memref<1x1x128xf32, #tpu.memory_space<vmem>> -> memref<1x128xf32, #tpu.memory_space<vmem>>
      %134 = tpu.memref_slice %arg5[%2] : memref<2x!tpu.dma_semaphore, #tpu.memory_space<semaphore_mem>> -> memref<1x!tpu.dma_semaphore, #tpu.memory_space<semaphore_mem>>
      %135 = tpu.memref_squeeze %134 : memref<1x!tpu.dma_semaphore, #tpu.memory_space<semaphore_mem>> -> memref<!tpu.dma_semaphore, #tpu.memory_space<semaphore_mem>>
      tpu.enqueue_dma source(%131 : memref<1x128xf32, #tpu.memory_space<any>>) target(%133 : memref<1x128xf32, #tpu.memory_space<vmem>>) target_semaphore(%135 : memref<!tpu.dma_semaphore, #tpu.memory_space<semaphore_mem>>)
      %c14_i32 = arith.constant 14 : i32
      %136 = arith.addi %23, %c14_i32 : i32
      %137 = arith.index_cast %136 : i32 to index
      %138 = memref.load %arg1[%137] : memref<24xi32, #tpu.memory_space<smem>>
      %c0_i32_58 = arith.constant 0 : i32
      %139 = tpu.memref_slice %arg2[%138, %c0_i32_58] : memref<512x128xf32, #tpu.memory_space<any>> -> memref<1x128xf32, #tpu.memory_space<any>>
      %c14_i32_59 = arith.constant 14 : i32
      %c0_i32_60 = arith.constant 0 : i32
      %140 = tpu.memref_slice %arg4[%2, %c14_i32_59, %c0_i32_60] : memref<2x24x128xf32, #tpu.memory_space<vmem>> -> memref<1x1x128xf32, #tpu.memory_space<vmem>>
      %141 = tpu.memref_squeeze %140 : memref<1x1x128xf32, #tpu.memory_space<vmem>> -> memref<1x128xf32, #tpu.memory_space<vmem>>
      %142 = tpu.memref_slice %arg5[%2] : memref<2x!tpu.dma_semaphore, #tpu.memory_space<semaphore_mem>> -> memref<1x!tpu.dma_semaphore, #tpu.memory_space<semaphore_mem>>
      %143 = tpu.memref_squeeze %142 : memref<1x!tpu.dma_semaphore, #tpu.memory_space<semaphore_mem>> -> memref<!tpu.dma_semaphore, #tpu.memory_space<semaphore_mem>>
      tpu.enqueue_dma source(%139 : memref<1x128xf32, #tpu.memory_space<any>>) target(%141 : memref<1x128xf32, #tpu.memory_space<vmem>>) target_semaphore(%143 : memref<!tpu.dma_semaphore, #tpu.memory_space<semaphore_mem>>)
      %c15_i32 = arith.constant 15 : i32
      %144 = arith.addi %23, %c15_i32 : i32
      %145 = arith.index_cast %144 : i32 to index
      %146 = memref.load %arg1[%145] : memref<24xi32, #tpu.memory_space<smem>>
      %c0_i32_61 = arith.constant 0 : i32
      %147 = tpu.memref_slice %arg2[%146, %c0_i32_61] : memref<512x128xf32, #tpu.memory_space<any>> -> memref<1x128xf32, #tpu.memory_space<any>>
      %c15_i32_62 = arith.constant 15 : i32
      %c0_i32_63 = arith.constant 0 : i32
      %148 = tpu.memref_slice %arg4[%2, %c15_i32_62, %c0_i32_63] : memref<2x24x128xf32, #tpu.memory_space<vmem>> -> memref<1x1x128xf32, #tpu.memory_space<vmem>>
      %149 = tpu.memref_squeeze %148 : memref<1x1x128xf32, #tpu.memory_space<vmem>> -> memref<1x128xf32, #tpu.memory_space<vmem>>
      %150 = tpu.memref_slice %arg5[%2] : memref<2x!tpu.dma_semaphore, #tpu.memory_space<semaphore_mem>> -> memref<1x!tpu.dma_semaphore, #tpu.memory_space<semaphore_mem>>
      %151 = tpu.memref_squeeze %150 : memref<1x!tpu.dma_semaphore, #tpu.memory_space<semaphore_mem>> -> memref<!tpu.dma_semaphore, #tpu.memory_space<semaphore_mem>>
      tpu.enqueue_dma source(%147 : memref<1x128xf32, #tpu.memory_space<any>>) target(%149 : memref<1x128xf32, #tpu.memory_space<vmem>>) target_semaphore(%151 : memref<!tpu.dma_semaphore, #tpu.memory_space<semaphore_mem>>)
      %c16_i32 = arith.constant 16 : i32
      %152 = arith.addi %23, %c16_i32 : i32
      %153 = arith.index_cast %152 : i32 to index
      %154 = memref.load %arg1[%153] : memref<24xi32, #tpu.memory_space<smem>>
      %c0_i32_64 = arith.constant 0 : i32
      %155 = tpu.memref_slice %arg2[%154, %c0_i32_64] : memref<512x128xf32, #tpu.memory_space<any>> -> memref<1x128xf32, #tpu.memory_space<any>>
      %c16_i32_65 = arith.constant 16 : i32
      %c0_i32_66 = arith.constant 0 : i32
      %156 = tpu.memref_slice %arg4[%2, %c16_i32_65, %c0_i32_66] : memref<2x24x128xf32, #tpu.memory_space<vmem>> -> memref<1x1x128xf32, #tpu.memory_space<vmem>>
      %157 = tpu.memref_squeeze %156 : memref<1x1x128xf32, #tpu.memory_space<vmem>> -> memref<1x128xf32, #tpu.memory_space<vmem>>
      %158 = tpu.memref_slice %arg5[%2] : memref<2x!tpu.dma_semaphore, #tpu.memory_space<semaphore_mem>> -> memref<1x!tpu.dma_semaphore, #tpu.memory_space<semaphore_mem>>
      %159 = tpu.memref_squeeze %158 : memref<1x!tpu.dma_semaphore, #tpu.memory_space<semaphore_mem>> -> memref<!tpu.dma_semaphore, #tpu.memory_space<semaphore_mem>>
      tpu.enqueue_dma source(%155 : memref<1x128xf32, #tpu.memory_space<any>>) target(%157 : memref<1x128xf32, #tpu.memory_space<vmem>>) target_semaphore(%159 : memref<!tpu.dma_semaphore, #tpu.memory_space<semaphore_mem>>)
      %c17_i32 = arith.constant 17 : i32
      %160 = arith.addi %23, %c17_i32 : i32
      %161 = arith.index_cast %160 : i32 to index
      %162 = memref.load %arg1[%161] : memref<24xi32, #tpu.memory_space<smem>>
      %c0_i32_67 = arith.constant 0 : i32
      %163 = tpu.memref_slice %arg2[%162, %c0_i32_67] : memref<512x128xf32, #tpu.memory_space<any>> -> memref<1x128xf32, #tpu.memory_space<any>>
      %c17_i32_68 = arith.constant 17 : i32
      %c0_i32_69 = arith.constant 0 : i32
      %164 = tpu.memref_slice %arg4[%2, %c17_i32_68, %c0_i32_69] : memref<2x24x128xf32, #tpu.memory_space<vmem>> -> memref<1x1x128xf32, #tpu.memory_space<vmem>>
      %165 = tpu.memref_squeeze %164 : memref<1x1x128xf32, #tpu.memory_space<vmem>> -> memref<1x128xf32, #tpu.memory_space<vmem>>
      %166 = tpu.memref_slice %arg5[%2] : memref<2x!tpu.dma_semaphore, #tpu.memory_space<semaphore_mem>> -> memref<1x!tpu.dma_semaphore, #tpu.memory_space<semaphore_mem>>
      %167 = tpu.memref_squeeze %166 : memref<1x!tpu.dma_semaphore, #tpu.memory_space<semaphore_mem>> -> memref<!tpu.dma_semaphore, #tpu.memory_space<semaphore_mem>>
      tpu.enqueue_dma source(%163 : memref<1x128xf32, #tpu.memory_space<any>>) target(%165 : memref<1x128xf32, #tpu.memory_space<vmem>>) target_semaphore(%167 : memref<!tpu.dma_semaphore, #tpu.memory_space<semaphore_mem>>)
      %c18_i32 = arith.constant 18 : i32
      %168 = arith.addi %23, %c18_i32 : i32
      %169 = arith.index_cast %168 : i32 to index
      %170 = memref.load %arg1[%169] : memref<24xi32, #tpu.memory_space<smem>>
      %c0_i32_70 = arith.constant 0 : i32
      %171 = tpu.memref_slice %arg2[%170, %c0_i32_70] : memref<512x128xf32, #tpu.memory_space<any>> -> memref<1x128xf32, #tpu.memory_space<any>>
      %c18_i32_71 = arith.constant 18 : i32
      %c0_i32_72 = arith.constant 0 : i32
      %172 = tpu.memref_slice %arg4[%2, %c18_i32_71, %c0_i32_72] : memref<2x24x128xf32, #tpu.memory_space<vmem>> -> memref<1x1x128xf32, #tpu.memory_space<vmem>>
      %173 = tpu.memref_squeeze %172 : memref<1x1x128xf32, #tpu.memory_space<vmem>> -> memref<1x128xf32, #tpu.memory_space<vmem>>
      %174 = tpu.memref_slice %arg5[%2] : memref<2x!tpu.dma_semaphore, #tpu.memory_space<semaphore_mem>> -> memref<1x!tpu.dma_semaphore, #tpu.memory_space<semaphore_mem>>
      %175 = tpu.memref_squeeze %174 : memref<1x!tpu.dma_semaphore, #tpu.memory_space<semaphore_mem>> -> memref<!tpu.dma_semaphore, #tpu.memory_space<semaphore_mem>>
      tpu.enqueue_dma source(%171 : memref<1x128xf32, #tpu.memory_space<any>>) target(%173 : memref<1x128xf32, #tpu.memory_space<vmem>>) target_semaphore(%175 : memref<!tpu.dma_semaphore, #tpu.memory_space<semaphore_mem>>)
      %c19_i32 = arith.constant 19 : i32
      %176 = arith.addi %23, %c19_i32 : i32
      %177 = arith.index_cast %176 : i32 to index
      %178 = memref.load %arg1[%177] : memref<24xi32, #tpu.memory_space<smem>>
      %c0_i32_73 = arith.constant 0 : i32
      %179 = tpu.memref_slice %arg2[%178, %c0_i32_73] : memref<512x128xf32, #tpu.memory_space<any>> -> memref<1x128xf32, #tpu.memory_space<any>>
      %c19_i32_74 = arith.constant 19 : i32
      %c0_i32_75 = arith.constant 0 : i32
      %180 = tpu.memref_slice %arg4[%2, %c19_i32_74, %c0_i32_75] : memref<2x24x128xf32, #tpu.memory_space<vmem>> -> memref<1x1x128xf32, #tpu.memory_space<vmem>>
      %181 = tpu.memref_squeeze %180 : memref<1x1x128xf32, #tpu.memory_space<vmem>> -> memref<1x128xf32, #tpu.memory_space<vmem>>
      %182 = tpu.memref_slice %arg5[%2] : memref<2x!tpu.dma_semaphore, #tpu.memory_space<semaphore_mem>> -> memref<1x!tpu.dma_semaphore, #tpu.memory_space<semaphore_mem>>
      %183 = tpu.memref_squeeze %182 : memref<1x!tpu.dma_semaphore, #tpu.memory_space<semaphore_mem>> -> memref<!tpu.dma_semaphore, #tpu.memory_space<semaphore_mem>>
      tpu.enqueue_dma source(%179 : memref<1x128xf32, #tpu.memory_space<any>>) target(%181 : memref<1x128xf32, #tpu.memory_space<vmem>>) target_semaphore(%183 : memref<!tpu.dma_semaphore, #tpu.memory_space<semaphore_mem>>)
      %c20_i32 = arith.constant 20 : i32
      %184 = arith.addi %23, %c20_i32 : i32
      %185 = arith.index_cast %184 : i32 to index
      %186 = memref.load %arg1[%185] : memref<24xi32, #tpu.memory_space<smem>>
      %c0_i32_76 = arith.constant 0 : i32
      %187 = tpu.memref_slice %arg2[%186, %c0_i32_76] : memref<512x128xf32, #tpu.memory_space<any>> -> memref<1x128xf32, #tpu.memory_space<any>>
      %c20_i32_77 = arith.constant 20 : i32
      %c0_i32_78 = arith.constant 0 : i32
      %188 = tpu.memref_slice %arg4[%2, %c20_i32_77, %c0_i32_78] : memref<2x24x128xf32, #tpu.memory_space<vmem>> -> memref<1x1x128xf32, #tpu.memory_space<vmem>>
      %189 = tpu.memref_squeeze %188 : memref<1x1x128xf32, #tpu.memory_space<vmem>> -> memref<1x128xf32, #tpu.memory_space<vmem>>
      %190 = tpu.memref_slice %arg5[%2] : memref<2x!tpu.dma_semaphore, #tpu.memory_space<semaphore_mem>> -> memref<1x!tpu.dma_semaphore, #tpu.memory_space<semaphore_mem>>
      %191 = tpu.memref_squeeze %190 : memref<1x!tpu.dma_semaphore, #tpu.memory_space<semaphore_mem>> -> memref<!tpu.dma_semaphore, #tpu.memory_space<semaphore_mem>>
      tpu.enqueue_dma source(%187 : memref<1x128xf32, #tpu.memory_space<any>>) target(%189 : memref<1x128xf32, #tpu.memory_space<vmem>>) target_semaphore(%191 : memref<!tpu.dma_semaphore, #tpu.memory_space<semaphore_mem>>)
      %c21_i32 = arith.constant 21 : i32
      %192 = arith.addi %23, %c21_i32 : i32
      %193 = arith.index_cast %192 : i32 to index
      %194 = memref.load %arg1[%193] : memref<24xi32, #tpu.memory_space<smem>>
      %c0_i32_79 = arith.constant 0 : i32
      %195 = tpu.memref_slice %arg2[%194, %c0_i32_79] : memref<512x128xf32, #tpu.memory_space<any>> -> memref<1x128xf32, #tpu.memory_space<any>>
      %c21_i32_80 = arith.constant 21 : i32
      %c0_i32_81 = arith.constant 0 : i32
      %196 = tpu.memref_slice %arg4[%2, %c21_i32_80, %c0_i32_81] : memref<2x24x128xf32, #tpu.memory_space<vmem>> -> memref<1x1x128xf32, #tpu.memory_space<vmem>>
      %197 = tpu.memref_squeeze %196 : memref<1x1x128xf32, #tpu.memory_space<vmem>> -> memref<1x128xf32, #tpu.memory_space<vmem>>
      %198 = tpu.memref_slice %arg5[%2] : memref<2x!tpu.dma_semaphore, #tpu.memory_space<semaphore_mem>> -> memref<1x!tpu.dma_semaphore, #tpu.memory_space<semaphore_mem>>
      %199 = tpu.memref_squeeze %198 : memref<1x!tpu.dma_semaphore, #tpu.memory_space<semaphore_mem>> -> memref<!tpu.dma_semaphore, #tpu.memory_space<semaphore_mem>>
      tpu.enqueue_dma source(%195 : memref<1x128xf32, #tpu.memory_space<any>>) target(%197 : memref<1x128xf32, #tpu.memory_space<vmem>>) target_semaphore(%199 : memref<!tpu.dma_semaphore, #tpu.memory_space<semaphore_mem>>)
      %c22_i32 = arith.constant 22 : i32
      %200 = arith.addi %23, %c22_i32 : i32
      %201 = arith.index_cast %200 : i32 to index
      %202 = memref.load %arg1[%201] : memref<24xi32, #tpu.memory_space<smem>>
      %c0_i32_82 = arith.constant 0 : i32
      %203 = tpu.memref_slice %arg2[%202, %c0_i32_82] : memref<512x128xf32, #tpu.memory_space<any>> -> memref<1x128xf32, #tpu.memory_space<any>>
      %c22_i32_83 = arith.constant 22 : i32
      %c0_i32_84 = arith.constant 0 : i32
      %204 = tpu.memref_slice %arg4[%2, %c22_i32_83, %c0_i32_84] : memref<2x24x128xf32, #tpu.memory_space<vmem>> -> memref<1x1x128xf32, #tpu.memory_space<vmem>>
      %205 = tpu.memref_squeeze %204 : memref<1x1x128xf32, #tpu.memory_space<vmem>> -> memref<1x128xf32, #tpu.memory_space<vmem>>
      %206 = tpu.memref_slice %arg5[%2] : memref<2x!tpu.dma_semaphore, #tpu.memory_space<semaphore_mem>> -> memref<1x!tpu.dma_semaphore, #tpu.memory_space<semaphore_mem>>
      %207 = tpu.memref_squeeze %206 : memref<1x!tpu.dma_semaphore, #tpu.memory_space<semaphore_mem>> -> memref<!tpu.dma_semaphore, #tpu.memory_space<semaphore_mem>>
      tpu.enqueue_dma source(%203 : memref<1x128xf32, #tpu.memory_space<any>>) target(%205 : memref<1x128xf32, #tpu.memory_space<vmem>>) target_semaphore(%207 : memref<!tpu.dma_semaphore, #tpu.memory_space<semaphore_mem>>)
      %c23_i32 = arith.constant 23 : i32
      %208 = arith.addi %23, %c23_i32 : i32
      %209 = arith.index_cast %208 : i32 to index
      %210 = memref.load %arg1[%209] : memref<24xi32, #tpu.memory_space<smem>>
      %c0_i32_85 = arith.constant 0 : i32
      %211 = tpu.memref_slice %arg2[%210, %c0_i32_85] : memref<512x128xf32, #tpu.memory_space<any>> -> memref<1x128xf32, #tpu.memory_space<any>>
      %c23_i32_86 = arith.constant 23 : i32
      %c0_i32_87 = arith.constant 0 : i32
      %212 = tpu.memref_slice %arg4[%2, %c23_i32_86, %c0_i32_87] : memref<2x24x128xf32, #tpu.memory_space<vmem>> -> memref<1x1x128xf32, #tpu.memory_space<vmem>>
      %213 = tpu.memref_squeeze %212 : memref<1x1x128xf32, #tpu.memory_space<vmem>> -> memref<1x128xf32, #tpu.memory_space<vmem>>
      %214 = tpu.memref_slice %arg5[%2] : memref<2x!tpu.dma_semaphore, #tpu.memory_space<semaphore_mem>> -> memref<1x!tpu.dma_semaphore, #tpu.memory_space<semaphore_mem>>
      %215 = tpu.memref_squeeze %214 : memref<1x!tpu.dma_semaphore, #tpu.memory_space<semaphore_mem>> -> memref<!tpu.dma_semaphore, #tpu.memory_space<semaphore_mem>>
      tpu.enqueue_dma source(%211 : memref<1x128xf32, #tpu.memory_space<any>>) target(%213 : memref<1x128xf32, #tpu.memory_space<vmem>>) target_semaphore(%215 : memref<!tpu.dma_semaphore, #tpu.memory_space<semaphore_mem>>)
    } else {
    }
    %c0_i32_6 = arith.constant 0 : i32
    %c0_i32_7 = arith.constant 0 : i32
    %10 = tpu.memref_slice %arg4[%0, %c0_i32_6, %c0_i32_7] : memref<2x24x128xf32, #tpu.memory_space<vmem>> -> memref<1x24x128xf32, #tpu.memory_space<vmem>>
    %11 = tpu.memref_squeeze %10 : memref<1x24x128xf32, #tpu.memory_space<vmem>> -> memref<24x128xf32, #tpu.memory_space<vmem>>
    %c0_i32_8 = arith.constant 0 : i32
    %c0_i32_9 = arith.constant 0 : i32
    %12 = tpu.memref_slice %arg4[%0, %c0_i32_8, %c0_i32_9] : memref<2x24x128xf32, #tpu.memory_space<vmem>> -> memref<1x24x128xf32, #tpu.memory_space<vmem>>
    %13 = tpu.memref_squeeze %12 : memref<1x24x128xf32, #tpu.memory_space<vmem>> -> memref<24x128xf32, #tpu.memory_space<vmem>>
    %14 = tpu.memref_slice %arg5[%0] : memref<2x!tpu.dma_semaphore, #tpu.memory_space<semaphore_mem>> -> memref<1x!tpu.dma_semaphore, #tpu.memory_space<semaphore_mem>>
    %15 = tpu.memref_squeeze %14 : memref<1x!tpu.dma_semaphore, #tpu.memory_space<semaphore_mem>> -> memref<!tpu.dma_semaphore, #tpu.memory_space<semaphore_mem>>
    tpu.wait_dma2 semaphore(%15 : memref<!tpu.dma_semaphore, #tpu.memory_space<semaphore_mem>>) src(%11 : memref<24x128xf32, #tpu.memory_space<vmem>>) dst(%13 : memref<24x128xf32, #tpu.memory_space<vmem>>)
    %16 = arith.index_cast %0 : i32 to index
    %c0 = arith.constant 0 : index
    %c0_10 = arith.constant 0 : index
    %17 = vector.load %arg4[%16, %c0, %c0_10] : memref<2x24x128xf32, #tpu.memory_space<vmem>>, vector<1x24x128xf32>
    %18 = vector.shape_cast %17 : vector<1x24x128xf32> to vector<24x128xf32>
    %cst = arith.constant 11.3137083 : f32
    %19 = vector.broadcast %cst : f32 to vector<24x128xf32>
    %20 = arith.mulf %18, %19 : vector<24x128xf32>
    %c0_11 = arith.constant 0 : index
    %c0_12 = arith.constant 0 : index
    %21 = vector.load %arg3[%c0_11, %c0_12] : memref<24x128xf32, #tpu.memory_space<vmem>>, vector<24x128xf32>
    tpu.vector_store %arg3[%c0_11, %c0_12], %20 {strides = array<i32>} : memref<24x128xf32, #tpu.memory_space<vmem>>, vector<24x128xf32>,
    return
  }
  func.func @transform_1(%arg0: i32, %arg1: memref<24xi32, #tpu.memory_space<smem>>) -> (i32, i32) {
    %c0_i32 = arith.constant 0 : i32
    %c0_i32_0 = arith.constant 0 : i32
    return %arg0, %c0_i32 : i32, i32
  }
}

</mosaic_0001>

<bundles_post_ra>
// kernel: tpu_custom_call.1
= control target key start
LH: loop header
LB: loop body
LE: loop exit
PB: predicated region body
PF: predicated region fallthrough
CT: control target
= control target key end

     0   :  { %s2195_s0 = inlined_call_operand.hbm [shape: s32[24], index: 0, kind: input, shape index: {}]   ;;  %s2196_s1 = inlined_call_operand.hbm [shape: f32[512,128], index: 1, kind: input, shape index: {}]   ;;  %s2197_s2 = inlined_call_operand.hbm [shape: f32[24,128], index: 2, kind: output, shape index: {}]  }
   0x1   :  { %s1131_s11 = scalar_lea.hbm %s2195_s0, 16 }
   0x2   :  { %p1132_p0 = scmp.ne.s32.totalorder %s2195_s0, %s1131_s11  ;;  %p1135_p1 = scmp.lt.u32.totalorder %s1131_s11, %s2195_s0 }
   0x4   :  { %p1137_p2 = pnand %p1135_p1, %p1132_p0 }
   0x6   :  { %1140 = shalt.err (!%p1137_p2)  }
   0x7   :  { %s1745_s16 = smov [#allocation5]  }
   0x8   :  { %8 = dma.hbm_to_smem %s2195_s0, 16, %s1745_s16, [#allocation4] }
   0x9   :  { %1739 = dma.done.wait [#allocation4], 16 }
   0xa   :  { %1740 = vsyncadd [#allocation4], 4294967280 }
   0xb   :  { %10 = sfence }
   0xc   :  { %11 = vsyncpa [#allocation7], 0  ;;  %s19_s19 = sld [smem:[#allocation5]]  ;;  %s1746_s20 = smov [#allocation2]  }
   0xd   :  { %s29_s21 = sshll.u32 %s1746_s20, 4  ;;  %s1800_s22 = sld [smem:[#allocation5 + $0x1]]  ;;  %s1802_s21 = int_to_ptr.vmem [resolvable:$true] %s29_s21 }
   0xe   :  { %s1747_s23 = smov [#allocation2 + $0x1]   ;;  %s1804_s25 = sld [smem:[#allocation5 + $0x2]] }
   0xf   :  { %s44_s24 = sshll.u32 %s1747_s23, 4  ;;  %s1748_s26 = smov [#allocation2 + $0x2]   ;;  %s1806_s24 = int_to_ptr.vmem [resolvable:$true] %s44_s24 }
  0x10   :  { %s59_s0 = sshll.u32 %s1748_s26, 4  ;;  %s1808_s27 = sld [smem:[#allocation5 + $0x3]]  ;;  %s1810_s0 = int_to_ptr.vmem [resolvable:$true] %s59_s0 }
  0x11   :  { %s1819_s8 = scalar_lea.hbm %s2196_s1, 8192 }
  0x12   :  { %s1006_s28 = sshll.u32 %s19_s19, 4 }
  0x13   :  { %s21_s3 = scalar_lea.hbm %s2196_s1, %s1006_s28  ;;  %s1008_s4 = sshll.u32 %s1800_s22, 4 }
  0x14   :  { %s1141_s5 = scalar_lea.hbm %s21_s3, 16  ;;  %p1144_p4 = scmp.lt.u32.totalorder %s21_s3, %s2196_s1 }
  0x15   :  { %p1142_p3 = scmp.ne.s32.totalorder %s21_s3, %s1141_s5  ;;  %p1145_p5 = scmp.lt.u32.totalorder %s1819_s8, %s1141_s5 }
  0x16   :  { %p1147_p7 = scmp.lt.u32.totalorder %s1141_s5, %s21_s3 }
  0x17   :  { %p1146_p6 = por %p1145_p5, %p1144_p4 }
  0x19   :  { %p1148_p8 = por %p1147_p7, %p1146_p6 }
  0x1b   :  { %p1149_p9 = pnand %p1148_p8, %p1142_p3 }
  0x1d   :  { %1152 = shalt.err (!%p1149_p9)  }
  0x1e   :  { %s1153_s11 = scalar_lea.vmem %s1802_s21, 16  ;;  %s1828_s12 = scalar_lea.vmem %s1802_s21, 768 }
  0x1f   :  { %p1154_p10 = scmp.ne.s32.totalorder %s1802_s21, %s1153_s11  ;;  %p1158_p11 = scmp.lt.s32.totalorder %s1802_s21, %s1802_s21 }
  0x20   :  { %p1159_p12 = scmp.lt.s32.totalorder %s1828_s12, %s1153_s11 }
  0x22   :  { %p1160_p13 = por %p1159_p12, %p1158_p11 }
  0x24   :  { %p1161_p0 = pnand %p1160_p13, %p1154_p10 }
  0x26   :  { %1164 = shalt.err (!%p1161_p0)  }
  0x27   :  { %32 = dma.hbm_to_vmem [thread:$0]  %s21_s3, 16, %s1802_s21, [#allocation3] }
  0x28   :  { %s35_s15 = scalar_lea.hbm %s2196_s1, %s1008_s4  ;;  %s1010_s16 = sshll.u32 %s1804_s25, 4 }
  0x29   :  { %s1165_s17 = scalar_lea.hbm %s35_s15, 16  ;;  %p1168_p2 = scmp.lt.u32.totalorder %s35_s15, %s2196_s1 }
  0x2a   :  { %p1166_p1 = scmp.ne.s32.totalorder %s35_s15, %s1165_s17  ;;  %p1169_p3 = scmp.lt.u32.totalorder %s1819_s8, %s1165_s17 }
  0x2b   :  { %p1171_p5 = scmp.lt.u32.totalorder %s1165_s17, %s35_s15 }
  0x2c   :  { %p1170_p4 = por %p1169_p3, %p1168_p2 }
  0x2e   :  { %p1172_p6 = por %p1171_p5, %p1170_p4 }
  0x30   :  { %p1173_p7 = pnand %p1172_p6, %p1166_p1 }
  0x32   :  { %1176 = shalt.err (!%p1173_p7)  }
  0x33   :  { %s1177_s20 = scalar_lea.vmem %s1806_s24, 16  ;;  %p1182_p9 = scmp.lt.s32.totalorder %s1806_s24, %s1802_s21 }
  0x34   :  { %p1178_p8 = scmp.ne.s32.totalorder %s1806_s24, %s1177_s20  ;;  %p1183_p10 = scmp.lt.s32.totalorder %s1828_s12, %s1177_s20 }
  0x36   :  { %p1184_p11 = por %p1183_p10, %p1182_p9 }
  0x38   :  { %p1185_p12 = pnand %p1184_p11, %p1178_p8 }
  0x3a   :  { %1188 = shalt.err (!%p1185_p12)  }
  0x3b   :  { %47 = dma.hbm_to_vmem [thread:$0]  %s35_s15, 16, %s1806_s24, [#allocation3] }
  0x3c   :  { %s50_s25 = scalar_lea.hbm %s2196_s1, %s1010_s16  ;;  %s1012_s26 = sshll.u32 %s1808_s27, 4 }
  0x3d   :  { %s1189_s28 = scalar_lea.hbm %s50_s25, 16  ;;  %p1192_p0 = scmp.lt.u32.totalorder %s50_s25, %s2196_s1 }
  0x3e   :  { %p1190_p13 = scmp.ne.s32.totalorder %s50_s25, %s1189_s28  ;;  %p1193_p1 = scmp.lt.u32.totalorder %s1819_s8, %s1189_s28 }
  0x3f   :  { %p1195_p3 = scmp.lt.u32.totalorder %s1189_s28, %s50_s25 }
  0x40   :  { %p1194_p2 = por %p1193_p1, %p1192_p0 }
  0x42   :  { %p1196_p4 = por %p1195_p3, %p1194_p2 }
  0x44   :  { %p1197_p5 = pnand %p1196_p4, %p1190_p13 }
  0x46   :  { %1200 = shalt.err (!%p1197_p5)  }
  0x47   :  { %s1201_s24 = scalar_lea.vmem %s1810_s0, 16  ;;  %p1206_p7 = scmp.lt.s32.totalorder %s1810_s0, %s1802_s21 }
  0x48   :  { %p1202_p6 = scmp.ne.s32.totalorder %s1810_s0, %s1201_s24  ;;  %p1207_p8 = scmp.lt.s32.totalorder %s1828_s12, %s1201_s24 }
  0x4a   :  { %p1208_p9 = por %p1207_p8, %p1206_p7 }
  0x4c   :  { %p1209_p10 = pnand %p1208_p9, %p1202_p6 }
  0x4e   :  { %1212 = shalt.err (!%p1209_p10)  }
  0x4f   :  { %62 = dma.hbm_to_vmem [thread:$0]  %s50_s25, 16, %s1810_s0, [#allocation3] }
  0x50   :  { %s65_s4 = scalar_lea.hbm %s2196_s1, %s1012_s26  ;;  %s1749_s5 = smov [#allocation2 + $0x3]  }
  0x51   :  { %s74_s6 = sshll.u32 %s1749_s5, 4  ;;  %s1865_s7 = sld [smem:[#allocation5 + $0x4]]  ;;  %s75_s6 = int_to_ptr.vmem [resolvable:$true] %s74_s6 }
  0x52   :  { %s1213_s9 = scalar_lea.hbm %s65_s4, 16  ;;  %p1216_p12 = scmp.lt.u32.totalorder %s65_s4, %s2196_s1 }
  0x53   :  { %p1214_p11 = scmp.ne.s32.totalorder %s65_s4, %s1213_s9  ;;  %p1217_p13 = scmp.lt.u32.totalorder %s1819_s8, %s1213_s9 }
  0x54   :  { %p1219_p1 = scmp.lt.u32.totalorder %s1213_s9, %s65_s4 }
  0x55   :  { %p1218_p0 = por %p1217_p13, %p1216_p12 }
  0x57   :  { %p1220_p2 = por %p1219_p1, %p1218_p0 }
  0x59   :  { %p1221_p3 = pnand %p1220_p2, %p1214_p11 }
  0x5b   :  { %1224 = shalt.err (!%p1221_p3)  }
  0x5c   :  { %s1225_s0 = scalar_lea.vmem %s75_s6, 16  ;;  %p1230_p5 = scmp.lt.s32.totalorder %s75_s6, %s1802_s21 }
  0x5d   :  { %p1226_p4 = scmp.ne.s32.totalorder %s75_s6, %s1225_s0  ;;  %p1231_p6 = scmp.lt.s32.totalorder %s1828_s12, %s1225_s0 }
  0x5f   :  { %p1232_p7 = por %p1231_p6, %p1230_p5 }
  0x61   :  { %p1233_p8 = pnand %p1232_p7, %p1226_p4 }
  0x63   :  { %1236 = shalt.err (!%p1233_p8)  }
  0x64   :  { %77 = dma.hbm_to_vmem [thread:$0]  %s65_s4, 16, %s75_s6, [#allocation3] }
  0x65   :  { %s1750_s13 = smov [#allocation2 + $0x4]   ;;  %s1873_s15 = sld [smem:[#allocation5 + $0x5]] }
  0x66   :  { %s89_s14 = sshll.u32 %s1750_s13, 4  ;;  %s1751_s16 = smov [#allocation2 + $0x5]   ;;  %s90_s14 = int_to_ptr.vmem [resolvable:$true] %s89_s14 }
  0x67   :  { %s104_s17 = sshll.u32 %s1751_s16, 4  ;;  %s1875_s18 = sld [smem:[#allocation5 + $0x6]]  ;;  %s1878_s17 = int_to_ptr.vmem [resolvable:$true] %s104_s17 }
  0x68   :  { %s1014_s19 = sshll.u32 %s1865_s7, 4 }
  0x69   :  { %s80_s23 = scalar_lea.hbm %s2196_s1, %s1014_s19 }
  0x6a   :  { %s1237_s25 = scalar_lea.hbm %s80_s23, 16  ;;  %p1240_p10 = scmp.lt.u32.totalorder %s80_s23, %s2196_s1 }
  0x6b   :  { %p1238_p9 = scmp.ne.s32.totalorder %s80_s23, %s1237_s25  ;;  %p1241_p11 = scmp.lt.u32.totalorder %s1819_s8, %s1237_s25 }
  0x6c   :  { %p1243_p13 = scmp.lt.u32.totalorder %s1237_s25, %s80_s23 }
  0x6d   :  { %p1242_p12 = por %p1241_p11, %p1240_p10 }
  0x6f   :  { %p1244_p0 = por %p1243_p13, %p1242_p12 }
  0x71   :  { %p1245_p1 = pnand %p1244_p0, %p1238_p9 }
  0x73   :  { %1248 = shalt.err (!%p1245_p1)  }
  0x74   :  { %s1249_s29 = scalar_lea.vmem %s90_s14, 16  ;;  %p1254_p3 = scmp.lt.s32.totalorder %s90_s14, %s1802_s21 }
  0x75   :  { %p1250_p2 = scmp.ne.s32.totalorder %s90_s14, %s1249_s29  ;;  %p1255_p4 = scmp.lt.s32.totalorder %s1828_s12, %s1249_s29 }
  0x77   :  { %p1256_p5 = por %p1255_p4, %p1254_p3 }
  0x79   :  { %p1257_p6 = pnand %p1256_p5, %p1250_p2 }
  0x7b   :  { %1260 = shalt.err (!%p1257_p6)  }
  0x7c   :  { %92 = dma.hbm_to_vmem [thread:$0]  %s80_s23, 16, %s90_s14, [#allocation3] }
  0x7d   :  { %s1016_s30 = sshll.u32 %s1873_s15, 4  ;;  %s1752_s24 = smov [#allocation2 + $0x6]  }
  0x7e   :  { %s119_s27 = sshll.u32 %s1752_s24, 4  ;;  %s95_s5 = scalar_lea.hbm %s2196_s1, %s1016_s30  ;;  %s1893_s27 = int_to_ptr.vmem [resolvable:$true] %s119_s27 }
  0x7f   :  { %s1261_s6 = scalar_lea.hbm %s95_s5, 16  ;;  %p1264_p8 = scmp.lt.u32.totalorder %s95_s5, %s2196_s1 }
  0x80   :  { %p1262_p7 = scmp.ne.s32.totalorder %s95_s5, %s1261_s6  ;;  %p1265_p9 = scmp.lt.u32.totalorder %s1819_s8, %s1261_s6 }
  0x81   :  { %p1267_p11 = scmp.lt.u32.totalorder %s1261_s6, %s95_s5 }
  0x82   :  { %p1266_p10 = por %p1265_p9, %p1264_p8 }
  0x84   :  { %p1268_p12 = por %p1267_p11, %p1266_p10 }
  0x86   :  { %p1269_p13 = pnand %p1268_p12, %p1262_p7 }
  0x88   :  { %1272 = shalt.err (!%p1269_p13)  }
  0x89   :  { %s1273_s10 = scalar_lea.vmem %s1878_s17, 16  ;;  %p1278_p1 = scmp.lt.s32.totalorder %s1878_s17, %s1802_s21 }
  0x8a   :  { %p1274_p0 = scmp.ne.s32.totalorder %s1878_s17, %s1273_s10  ;;  %p1279_p2 = scmp.lt.s32.totalorder %s1828_s12, %s1273_s10 }
  0x8c   :  { %p1280_p3 = por %p1279_p2, %p1278_p1 }
  0x8e   :  { %p1281_p4 = pnand %p1280_p3, %p1274_p0 }
  0x90   :  { %1284 = shalt.err (!%p1281_p4)  }
  0x91   :  { %107 = dma.hbm_to_vmem [thread:$0]  %s95_s5, 16, %s1878_s17, [#allocation3] }
  0x92   :  { %s1018_s11 = sshll.u32 %s1875_s18, 4  ;;  %s1906_s0 = sld [smem:[#allocation5 + $0x7]] }
  0x93   :  { %s110_s15 = scalar_lea.hbm %s2196_s1, %s1018_s11 }
  0x94   :  { %s1285_s16 = scalar_lea.hbm %s110_s15, 16  ;;  %p1288_p6 = scmp.lt.u32.totalorder %s110_s15, %s2196_s1 }
  0x95   :  { %p1286_p5 = scmp.ne.s32.totalorder %s110_s15, %s1285_s16  ;;  %p1289_p7 = scmp.lt.u32.totalorder %s1819_s8, %s1285_s16 }
  0x96   :  { %p1291_p9 = scmp.lt.u32.totalorder %s1285_s16, %s110_s15 }
  0x97   :  { %p1290_p8 = por %p1289_p7, %p1288_p6 }
  0x99   :  { %p1292_p10 = por %p1291_p9, %p1290_p8 }
  0x9b   :  { %p1293_p11 = pnand %p1292_p10, %p1286_p5 }
  0x9d   :  { %1296 = shalt.err (!%p1293_p11)  }
  0x9e   :  { %s1297_s17 = scalar_lea.vmem %s1893_s27, 16  ;;  %p1302_p13 = scmp.lt.s32.totalorder %s1893_s27, %s1802_s21 }
  0x9f   :  { %p1298_p12 = scmp.ne.s32.totalorder %s1893_s27, %s1297_s17  ;;  %p1303_p0 = scmp.lt.s32.totalorder %s1828_s12, %s1297_s17 }
  0xa1   :  { %p1304_p1 = por %p1303_p0, %p1302_p13 }
  0xa3   :  { %p1305_p2 = pnand %p1304_p1, %p1298_p12 }
  0xa5   :  { %1308 = shalt.err (!%p1305_p2)  }
  0xa6   :  { %122 = dma.hbm_to_vmem [thread:$0]  %s110_s15, 16, %s1893_s27, [#allocation3] }
  0xa7   :  { %s1753_s18 = smov [#allocation2 + $0x7]   ;;  %s1921_s23 = sld [smem:[#allocation5 + $0x8]] }
  0xa8   :  { %s134_s22 = sshll.u32 %s1753_s18, 4  ;;  %s1754_s25 = smov [#allocation2 + $0x8]   ;;  %s135_s22 = int_to_ptr.vmem [resolvable:$true] %s134_s22 }
  0xa9   :  { %s149_s26 = sshll.u32 %s1754_s25, 4  ;;  %s1923_s28 = sld [smem:[#allocation5 + $0x9]]  ;;  %s1926_s26 = int_to_ptr.vmem [resolvable:$true] %s149_s26 }
  0xaa   :  { %s1020_s29 = sshll.u32 %s1906_s0, 4 }
  0xab   :  { %s125_s3 = scalar_lea.hbm %s2196_s1, %s1020_s29 }
  0xac   :  { %s1309_s4 = scalar_lea.hbm %s125_s3, 16  ;;  %p1312_p4 = scmp.lt.u32.totalorder %s125_s3, %s2196_s1 }
  0xad   :  { %p1310_p3 = scmp.ne.s32.totalorder %s125_s3, %s1309_s4  ;;  %p1313_p5 = scmp.lt.u32.totalorder %s1819_s8, %s1309_s4 }
  0xae   :  { %p1315_p7 = scmp.lt.u32.totalorder %s1309_s4, %s125_s3 }
  0xaf   :  { %p1314_p6 = por %p1313_p5, %p1312_p4 }
  0xb1   :  { %p1316_p8 = por %p1315_p7, %p1314_p6 }
  0xb3   :  { %p1317_p9 = pnand %p1316_p8, %p1310_p3 }
  0xb5   :  { %1320 = shalt.err (!%p1317_p9)  }
  0xb6   :  { %s1321_s6 = scalar_lea.vmem %s135_s22, 16  ;;  %p1326_p11 = scmp.lt.s32.totalorder %s135_s22, %s1802_s21 }
  0xb7   :  { %p1322_p10 = scmp.ne.s32.totalorder %s135_s22, %s1321_s6  ;;  %p1327_p12 = scmp.lt.s32.totalorder %s1828_s12, %s1321_s6 }
  0xb9   :  { %p1328_p13 = por %p1327_p12, %p1326_p11 }
  0xbb   :  { %p1329_p0 = pnand %p1328_p13, %p1322_p10 }
  0xbd   :  { %1332 = shalt.err (!%p1329_p0)  }
  0xbe   :  { %137 = dma.hbm_to_vmem [thread:$0]  %s125_s3, 16, %s135_s22, [#allocation3] }
  0xbf   :  { %s1022_s7 = sshll.u32 %s1921_s23, 4  ;;  %s1755_s9 = smov [#allocation2 + $0x9]  }
  0xc0   :  { %s164_s10 = sshll.u32 %s1755_s9, 4  ;;  %s140_s13 = scalar_lea.hbm %s2196_s1, %s1022_s7  ;;  %s1941_s10 = int_to_ptr.vmem [resolvable:$true] %s164_s10 }
  0xc1   :  { %s1333_s14 = scalar_lea.hbm %s140_s13, 16  ;;  %p1336_p2 = scmp.lt.u32.totalorder %s140_s13, %s2196_s1 }
  0xc2   :  { %p1334_p1 = scmp.ne.s32.totalorder %s140_s13, %s1333_s14  ;;  %p1337_p3 = scmp.lt.u32.totalorder %s1819_s8, %s1333_s14 }
  0xc3   :  { %p1339_p5 = scmp.lt.u32.totalorder %s1333_s14, %s140_s13 }
  0xc4   :  { %p1338_p4 = por %p1337_p3, %p1336_p2 }
  0xc6   :  { %p1340_p6 = por %p1339_p5, %p1338_p4 }
  0xc8   :  { %p1341_p7 = pnand %p1340_p6, %p1334_p1 }
  0xca   :  { %1344 = shalt.err (!%p1341_p7)  }
  0xcb   :  { %s1345_s19 = scalar_lea.vmem %s1926_s26, 16  ;;  %p1350_p9 = scmp.lt.s32.totalorder %s1926_s26, %s1802_s21 }
  0xcc   :  { %p1346_p8 = scmp.ne.s32.totalorder %s1926_s26, %s1345_s19  ;;  %p1351_p10 = scmp.lt.s32.totalorder %s1828_s12, %s1345_s19 }
  0xce   :  { %p1352_p11 = por %p1351_p10, %p1350_p9 }
  0xd0   :  { %p1353_p12 = pnand %p1352_p11, %p1346_p8 }
  0xd2   :  { %1356 = shalt.err (!%p1353_p12)  }
  0xd3   :  { %152 = dma.hbm_to_vmem [thread:$0]  %s140_s13, 16, %s1926_s26, [#allocation3] }
  0xd4   :  { %s1024_s20 = sshll.u32 %s1923_s28, 4  ;;  %s1954_s17 = sld [smem:[#allocation5 + $0xa]] }
  0xd5   :  { %s155_s23 = scalar_lea.hbm %s2196_s1, %s1024_s20 }
  0xd6   :  { %s1357_s25 = scalar_lea.hbm %s155_s23, 16  ;;  %p1360_p0 = scmp.lt.u32.totalorder %s155_s23, %s2196_s1 }
  0xd7   :  { %p1358_p13 = scmp.ne.s32.totalorder %s155_s23, %s1357_s25  ;;  %p1361_p1 = scmp.lt.u32.totalorder %s1819_s8, %s1357_s25 }
  0xd8   :  { %p1363_p3 = scmp.lt.u32.totalorder %s1357_s25, %s155_s23 }
  0xd9   :  { %p1362_p2 = por %p1361_p1, %p1360_p0 }
  0xdb   :  { %p1364_p4 = por %p1363_p3, %p1362_p2 }
  0xdd   :  { %p1365_p5 = pnand %p1364_p4, %p1358_p13 }
  0xdf   :  { %1368 = shalt.err (!%p1365_p5)  }
  0xe0   :  { %s1369_s26 = scalar_lea.vmem %s1941_s10, 16  ;;  %p1374_p7 = scmp.lt.s32.totalorder %s1941_s10, %s1802_s21 }
  0xe1   :  { %p1370_p6 = scmp.ne.s32.totalorder %s1941_s10, %s1369_s26  ;;  %p1375_p8 = scmp.lt.s32.totalorder %s1828_s12, %s1369_s26 }
  0xe3   :  { %p1376_p9 = por %p1375_p8, %p1374_p7 }
  0xe5   :  { %p1377_p10 = pnand %p1376_p9, %p1370_p6 }
  0xe7   :  { %1380 = shalt.err (!%p1377_p10)  }
  0xe8   :  { %167 = dma.hbm_to_vmem [thread:$0]  %s155_s23, 16, %s1941_s10, [#allocation3] }
  0xe9   :  { %s1756_s28 = smov [#allocation2 + $0xa]   ;;  %s1969_s3 = sld [smem:[#allocation5 + $0xb]] }
  0xea   :  { %s179_s24 = sshll.u32 %s1756_s28, 4  ;;  %s1757_s4 = smov [#allocation2 + $0xb]   ;;  %s180_s24 = int_to_ptr.vmem [resolvable:$true] %s179_s24 }
  0xeb   :  { %s194_s5 = sshll.u32 %s1757_s4, 4  ;;  %s1971_s27 = sld [smem:[#allocation5 + $0xc]]  ;;  %s1974_s5 = int_to_ptr.vmem [resolvable:$true] %s194_s5 }
  0xec   :  { %s1026_s6 = sshll.u32 %s1954_s17, 4 }
  0xed   :  { %s170_s11 = scalar_lea.hbm %s2196_s1, %s1026_s6 }
  0xee   :  { %s1381_s0 = scalar_lea.hbm %s170_s11, 16  ;;  %p1384_p12 = scmp.lt.u32.totalorder %s170_s11, %s2196_s1 }
  0xef   :  { %p1382_p11 = scmp.ne.s32.totalorder %s170_s11, %s1381_s0  ;;  %p1385_p13 = scmp.lt.u32.totalorder %s1819_s8, %s1381_s0 }
  0xf0   :  { %p1387_p1 = scmp.lt.u32.totalorder %s1381_s0, %s170_s11 }
  0xf1   :  { %p1386_p0 = por %p1385_p13, %p1384_p12 }
  0xf3   :  { %p1388_p2 = por %p1387_p1, %p1386_p0 }
  0xf5   :  { %p1389_p3 = pnand %p1388_p2, %p1382_p11 }
  0xf7   :  { %1392 = shalt.err (!%p1389_p3)  }
  0xf8   :  { %s1393_s14 = scalar_lea.vmem %s180_s24, 16  ;;  %p1398_p5 = scmp.lt.s32.totalorder %s180_s24, %s1802_s21 }
  0xf9   :  { %p1394_p4 = scmp.ne.s32.totalorder %s180_s24, %s1393_s14  ;;  %p1399_p6 = scmp.lt.s32.totalorder %s1828_s12, %s1393_s14 }
  0xfb   :  { %p1400_p7 = por %p1399_p6, %p1398_p5 }
  0xfd   :  { %p1401_p8 = pnand %p1400_p7, %p1394_p4 }
  0xff   :  { %1404 = shalt.err (!%p1401_p8)  }
 0x100   :  { %182 = dma.hbm_to_vmem [thread:$0]  %s170_s11, 16, %s180_s24, [#allocation3] }
 0x101   :  { %s1028_s15 = sshll.u32 %s1969_s3, 4  ;;  %s1758_s16 = smov [#allocation2 + $0xc]  }
 0x102   :  { %s209_s19 = sshll.u32 %s1758_s16, 4  ;;  %s185_s18 = scalar_lea.hbm %s2196_s1, %s1028_s15  ;;  %s1989_s19 = int_to_ptr.vmem [resolvable:$true] %s209_s19 }
 0x103   :  { %s1405_s22 = scalar_lea.hbm %s185_s18, 16  ;;  %p1408_p10 = scmp.lt.u32.totalorder %s185_s18, %s2196_s1 }
 0x104   :  { %p1406_p9 = scmp.ne.s32.totalorder %s185_s18, %s1405_s22  ;;  %p1409_p11 = scmp.lt.u32.totalorder %s1819_s8, %s1405_s22 }
 0x105   :  { %p1411_p13 = scmp.lt.u32.totalorder %s1405_s22, %s185_s18 }
 0x106   :  { %p1410_p12 = por %p1409_p11, %p1408_p10 }
 0x108   :  { %p1412_p0 = por %p1411_p13, %p1410_p12 }
 0x10a   :  { %p1413_p1 = pnand %p1412_p0, %p1406_p9 }
 0x10c   :  { %1416 = shalt.err (!%p1413_p1)  }
 0x10d   :  { %s1417_s29 = scalar_lea.vmem %s1974_s5, 16  ;;  %p1422_p3 = scmp.lt.s32.totalorder %s1974_s5, %s1802_s21 }
 0x10e   :  { %p1418_p2 = scmp.ne.s32.totalorder %s1974_s5, %s1417_s29  ;;  %p1423_p4 = scmp.lt.s32.totalorder %s1828_s12, %s1417_s29 }
 0x110   :  { %p1424_p5 = por %p1423_p4, %p1422_p3 }
 0x112   :  { %p1425_p6 = pnand %p1424_p5, %p1418_p2 }
 0x114   :  { %1428 = shalt.err (!%p1425_p6)  }
 0x115   :  { %197 = dma.hbm_to_vmem [thread:$0]  %s185_s18, 16, %s1974_s5, [#allocation3] }
 0x116   :  { %s1030_s30 = sshll.u32 %s1971_s27, 4  ;;  %s2002_s26 = sld [smem:[#allocation5 + $0xd]] }
 0x117   :  { %s200_s3 = scalar_lea.hbm %s2196_s1, %s1030_s30 }
 0x118   :  { %s1429_s4 = scalar_lea.hbm %s200_s3, 16  ;;  %p1432_p8 = scmp.lt.u32.totalorder %s200_s3, %s2196_s1 }
 0x119   :  { %p1430_p7 = scmp.ne.s32.totalorder %s200_s3, %s1429_s4  ;;  %p1433_p9 = scmp.lt.u32.totalorder %s1819_s8, %s1429_s4 }
 0x11a   :  { %p1435_p11 = scmp.lt.u32.totalorder %s1429_s4, %s200_s3 }
 0x11b   :  { %p1434_p10 = por %p1433_p9, %p1432_p8 }
 0x11d   :  { %p1436_p12 = por %p1435_p11, %p1434_p10 }
 0x11f   :  { %p1437_p13 = pnand %p1436_p12, %p1430_p7 }
 0x121   :  { %1440 = shalt.err (!%p1437_p13)  }
 0x122   :  { %s1441_s5 = scalar_lea.vmem %s1989_s19, 16  ;;  %p1446_p1 = scmp.lt.s32.totalorder %s1989_s19, %s1802_s21 }
 0x123   :  { %p1442_p0 = scmp.ne.s32.totalorder %s1989_s19, %s1441_s5  ;;  %p1447_p2 = scmp.lt.s32.totalorder %s1828_s12, %s1441_s5 }
 0x125   :  { %p1448_p3 = por %p1447_p2, %p1446_p1 }
 0x127   :  { %p1449_p4 = pnand %p1448_p3, %p1442_p0 }
 0x129   :  { %1452 = shalt.err (!%p1449_p4)  }
 0x12a   :  { %212 = dma.hbm_to_vmem [thread:$0]  %s200_s3, 16, %s1989_s19, [#allocation3] }
 0x12b   :  { %s1759_s27 = smov [#allocation2 + $0xd]   ;;  %s2017_s11 = sld [smem:[#allocation5 + $0xe]] }
 0x12c   :  { %s224_s9 = sshll.u32 %s1759_s27, 4  ;;  %s1760_s0 = smov [#allocation2 + $0xe]   ;;  %s225_s9 = int_to_ptr.vmem [resolvable:$true] %s224_s9 }
 0x12d   :  { %s239_s13 = sshll.u32 %s1760_s0, 4  ;;  %s2019_s10 = sld [smem:[#allocation5 + $0xf]]  ;;  %s2022_s13 = int_to_ptr.vmem [resolvable:$true] %s239_s13 }
 0x12e   :  { %s1032_s14 = sshll.u32 %s2002_s26, 4 }
 0x12f   :  { %s215_s20 = scalar_lea.hbm %s2196_s1, %s1032_s14 }
 0x130   :  { %s1453_s17 = scalar_lea.hbm %s215_s20, 16  ;;  %p1456_p6 = scmp.lt.u32.totalorder %s215_s20, %s2196_s1 }
 0x131   :  { %p1454_p5 = scmp.ne.s32.totalorder %s215_s20, %s1453_s17  ;;  %p1457_p7 = scmp.lt.u32.totalorder %s1819_s8, %s1453_s17 }
 0x132   :  { %p1459_p9 = scmp.lt.u32.totalorder %s1453_s17, %s215_s20 }
 0x133   :  { %p1458_p8 = por %p1457_p7, %p1456_p6 }
 0x135   :  { %p1460_p10 = por %p1459_p9, %p1458_p8 }
 0x137   :  { %p1461_p11 = pnand %p1460_p10, %p1454_p5 }
 0x139   :  { %1464 = shalt.err (!%p1461_p11)  }
 0x13a   :  { %s1465_s22 = scalar_lea.vmem %s225_s9, 16  ;;  %p1470_p13 = scmp.lt.s32.totalorder %s225_s9, %s1802_s21 }
 0x13b   :  { %p1466_p12 = scmp.ne.s32.totalorder %s225_s9, %s1465_s22  ;;  %p1471_p0 = scmp.lt.s32.totalorder %s1828_s12, %s1465_s22 }
 0x13d   :  { %p1472_p1 = por %p1471_p0, %p1470_p13 }
 0x13f   :  { %p1473_p2 = pnand %p1472_p1, %p1466_p12 }
 0x141   :  { %1476 = shalt.err (!%p1473_p2)  }
 0x142   :  { %227 = dma.hbm_to_vmem [thread:$0]  %s215_s20, 16, %s225_s9, [#allocation3] }
 0x143   :  { %s1034_s23 = sshll.u32 %s2017_s11, 4  ;;  %s1761_s25 = smov [#allocation2 + $0xf]  }
 0x144   :  { %s254_s29 = sshll.u32 %s1761_s25, 4  ;;  %s230_s28 = scalar_lea.hbm %s2196_s1, %s1034_s23  ;;  %s2037_s29 = int_to_ptr.vmem [resolvable:$true] %s254_s29 }
 0x145   :  { %s1477_s24 = scalar_lea.hbm %s230_s28, 16  ;;  %p1480_p4 = scmp.lt.u32.totalorder %s230_s28, %s2196_s1 }
 0x146   :  { %p1478_p3 = scmp.ne.s32.totalorder %s230_s28, %s1477_s24  ;;  %p1481_p5 = scmp.lt.u32.totalorder %s1819_s8, %s1477_s24 }
 0x147   :  { %p1483_p7 = scmp.lt.u32.totalorder %s1477_s24, %s230_s28 }
 0x148   :  { %p1482_p6 = por %p1481_p5, %p1480_p4 }
 0x14a   :  { %p1484_p8 = por %p1483_p7, %p1482_p6 }
 0x14c   :  { %p1485_p9 = pnand %p1484_p8, %p1478_p3 }
 0x14e   :  { %1488 = shalt.err (!%p1485_p9)  }
 0x14f   :  { %s1489_s6 = scalar_lea.vmem %s2022_s13, 16  ;;  %p1494_p11 = scmp.lt.s32.totalorder %s2022_s13, %s1802_s21 }
 0x150   :  { %p1490_p10 = scmp.ne.s32.totalorder %s2022_s13, %s1489_s6  ;;  %p1495_p12 = scmp.lt.s32.totalorder %s1828_s12, %s1489_s6 }
 0x152   :  { %p1496_p13 = por %p1495_p12, %p1494_p11 }
 0x154   :  { %p1497_p0 = pnand %p1496_p13, %p1490_p10 }
 0x156   :  { %1500 = shalt.err (!%p1497_p0)  }
 0x157   :  { %242 = dma.hbm_to_vmem [thread:$0]  %s230_s28, 16, %s2022_s13, [#allocation3] }
 0x158   :  { %s1036_s7 = sshll.u32 %s2019_s10, 4  ;;  %s2050_s5 = sld [smem:[#allocation5 + $0x10]] }
 0x159   :  { %s245_s11 = scalar_lea.hbm %s2196_s1, %s1036_s7 }
 0x15a   :  { %s1501_s0 = scalar_lea.hbm %s245_s11, 16  ;;  %p1504_p2 = scmp.lt.u32.totalorder %s245_s11, %s2196_s1 }
 0x15b   :  { %p1502_p1 = scmp.ne.s32.totalorder %s245_s11, %s1501_s0  ;;  %p1505_p3 = scmp.lt.u32.totalorder %s1819_s8, %s1501_s0 }
 0x15c   :  { %p1507_p5 = scmp.lt.u32.totalorder %s1501_s0, %s245_s11 }
 0x15d   :  { %p1506_p4 = por %p1505_p3, %p1504_p2 }
 0x15f   :  { %p1508_p6 = por %p1507_p5, %p1506_p4 }
 0x161   :  { %p1509_p7 = pnand %p1508_p6, %p1502_p1 }
 0x163   :  { %1512 = shalt.err (!%p1509_p7)  }
 0x164   :  { %s1513_s13 = scalar_lea.vmem %s2037_s29, 16  ;;  %p1518_p9 = scmp.lt.s32.totalorder %s2037_s29, %s1802_s21 }
 0x165   :  { %p1514_p8 = scmp.ne.s32.totalorder %s2037_s29, %s1513_s13  ;;  %p1519_p10 = scmp.lt.s32.totalorder %s1828_s12, %s1513_s13 }
 0x167   :  { %p1520_p11 = por %p1519_p10, %p1518_p9 }
 0x169   :  { %p1521_p12 = pnand %p1520_p11, %p1514_p8 }
 0x16b   :  { %1524 = shalt.err (!%p1521_p12)  }
 0x16c   :  { %257 = dma.hbm_to_vmem [thread:$0]  %s245_s11, 16, %s2037_s29, [#allocation3] }
 0x16d   :  { %s1762_s10 = smov [#allocation2 + $0x10]   ;;  %s2065_s20 = sld [smem:[#allocation5 + $0x11]] }
 0x16e   :  { %s269_s16 = sshll.u32 %s1762_s10, 4  ;;  %s1763_s17 = smov [#allocation2 + $0x11]   ;;  %s270_s16 = int_to_ptr.vmem [resolvable:$true] %s269_s16 }
 0x16f   :  { %s284_s18 = sshll.u32 %s1763_s17, 4  ;;  %s2067_s19 = sld [smem:[#allocation5 + $0x12]]  ;;  %s2070_s18 = int_to_ptr.vmem [resolvable:$true] %s284_s18 }
 0x170   :  { %s1038_s22 = sshll.u32 %s2050_s5, 4 }
 0x171   :  { %s260_s30 = scalar_lea.hbm %s2196_s1, %s1038_s22 }
 0x172   :  { %s1525_s26 = scalar_lea.hbm %s260_s30, 16  ;;  %p1528_p0 = scmp.lt.u32.totalorder %s260_s30, %s2196_s1 }
 0x173   :  { %p1526_p13 = scmp.ne.s32.totalorder %s260_s30, %s1525_s26  ;;  %p1529_p1 = scmp.lt.u32.totalorder %s1819_s8, %s1525_s26 }
 0x174   :  { %p1531_p3 = scmp.lt.u32.totalorder %s1525_s26, %s260_s30 }
 0x175   :  { %p1530_p2 = por %p1529_p1, %p1528_p0 }
 0x177   :  { %p1532_p4 = por %p1531_p3, %p1530_p2 }
 0x179   :  { %p1533_p5 = pnand %p1532_p4, %p1526_p13 }
 0x17b   :  { %1536 = shalt.err (!%p1533_p5)  }
 0x17c   :  { %s1537_s24 = scalar_lea.vmem %s270_s16, 16  ;;  %p1542_p7 = scmp.lt.s32.totalorder %s270_s16, %s1802_s21 }
 0x17d   :  { %p1538_p6 = scmp.ne.s32.totalorder %s270_s16, %s1537_s24  ;;  %p1543_p8 = scmp.lt.s32.totalorder %s1828_s12, %s1537_s24 }
 0x17f   :  { %p1544_p9 = por %p1543_p8, %p1542_p7 }
 0x181   :  { %p1545_p10 = pnand %p1544_p9, %p1538_p6 }
 0x183   :  { %1548 = shalt.err (!%p1545_p10)  }
 0x184   :  { %272 = dma.hbm_to_vmem [thread:$0]  %s260_s30, 16, %s270_s16, [#allocation3] }
 0x185   :  { %s1040_s3 = sshll.u32 %s2065_s20, 4  ;;  %s1764_s4 = smov [#allocation2 + $0x12]  }
 0x186   :  { %s299_s6 = sshll.u32 %s1764_s4, 4  ;;  %s275_s27 = scalar_lea.hbm %s2196_s1, %s1040_s3  ;;  %s2085_s6 = int_to_ptr.vmem [resolvable:$true] %s299_s6 }
 0x187   :  { %s1549_s9 = scalar_lea.hbm %s275_s27, 16  ;;  %p1552_p12 = scmp.lt.u32.totalorder %s275_s27, %s2196_s1 }
 0x188   :  { %p1550_p11 = scmp.ne.s32.totalorder %s275_s27, %s1549_s9  ;;  %p1553_p13 = scmp.lt.u32.totalorder %s1819_s8, %s1549_s9 }
 0x189   :  { %p1555_p1 = scmp.lt.u32.totalorder %s1549_s9, %s275_s27 }
 0x18a   :  { %p1554_p0 = por %p1553_p13, %p1552_p12 }
 0x18c   :  { %p1556_p2 = por %p1555_p1, %p1554_p0 }
 0x18e   :  { %p1557_p3 = pnand %p1556_p2, %p1550_p11 }
 0x190   :  { %1560 = shalt.err (!%p1557_p3)  }
 0x191   :  { %s1561_s14 = scalar_lea.vmem %s2070_s18, 16  ;;  %p1566_p5 = scmp.lt.s32.totalorder %s2070_s18, %s1802_s21 }
 0x192   :  { %p1562_p4 = scmp.ne.s32.totalorder %s2070_s18, %s1561_s14  ;;  %p1567_p6 = scmp.lt.s32.totalorder %s1828_s12, %s1561_s14 }
 0x194   :  { %p1568_p7 = por %p1567_p6, %p1566_p5 }
 0x196   :  { %p1569_p8 = pnand %p1568_p7, %p1562_p4 }
 0x198   :  { %1572 = shalt.err (!%p1569_p8)  }
 0x199   :  { %287 = dma.hbm_to_vmem [thread:$0]  %s275_s27, 16, %s2070_s18, [#allocation3] }
 0x19a   :  { %s1042_s15 = sshll.u32 %s2067_s19, 4  ;;  %s2098_s13 = sld [smem:[#allocation5 + $0x13]] }
 0x19b   :  { %s290_s20 = scalar_lea.hbm %s2196_s1, %s1042_s15 }
 0x19c   :  { %s1573_s17 = scalar_lea.hbm %s290_s20, 16  ;;  %p1576_p10 = scmp.lt.u32.totalorder %s290_s20, %s2196_s1 }
 0x19d   :  { %p1574_p9 = scmp.ne.s32.totalorder %s290_s20, %s1573_s17  ;;  %p1577_p11 = scmp.lt.u32.totalorder %s1819_s8, %s1573_s17 }
 0x19e   :  { %p1579_p13 = scmp.lt.u32.totalorder %s1573_s17, %s290_s20 }
 0x19f   :  { %p1578_p12 = por %p1577_p11, %p1576_p10 }
 0x1a1   :  { %p1580_p0 = por %p1579_p13, %p1578_p12 }
 0x1a3   :  { %p1581_p1 = pnand %p1580_p0, %p1574_p9 }
 0x1a5   :  { %1584 = shalt.err (!%p1581_p1)  }
 0x1a6   :  { %s1585_s18 = scalar_lea.vmem %s2085_s6, 16  ;;  %p1590_p3 = scmp.lt.s32.totalorder %s2085_s6, %s1802_s21 }
 0x1a7   :  { %p1586_p2 = scmp.ne.s32.totalorder %s2085_s6, %s1585_s18  ;;  %p1591_p4 = scmp.lt.s32.totalorder %s1828_s12, %s1585_s18 }
 0x1a9   :  { %p1592_p5 = por %p1591_p4, %p1590_p3 }
 0x1ab   :  { %p1593_p6 = pnand %p1592_p5, %p1586_p2 }
 0x1ad   :  { %1596 = shalt.err (!%p1593_p6)  }
 0x1ae   :  { %302 = dma.hbm_to_vmem [thread:$0]  %s290_s20, 16, %s2085_s6, [#allocation3] }
 0x1af   :  { %s1765_s19 = smov [#allocation2 + $0x13]   ;;  %s2113_s30 = sld [smem:[#allocation5 + $0x14]] }
 0x1b0   :  { %s314_s25 = sshll.u32 %s1765_s19, 4  ;;  %s1766_s26 = smov [#allocation2 + $0x14]   ;;  %s315_s25 = int_to_ptr.vmem [resolvable:$true] %s314_s25 }
 0x1b1   :  { %s329_s28 = sshll.u32 %s1766_s26, 4  ;;  %s2115_s29 = sld [smem:[#allocation5 + $0x15]]  ;;  %s2118_s28 = int_to_ptr.vmem [resolvable:$true] %s329_s28 }
 0x1b2   :  { %s1044_s24 = sshll.u32 %s2098_s13, 4 }
 0x1b3   :  { %s305_s7 = scalar_lea.hbm %s2196_s1, %s1044_s24 }
 0x1b4   :  { %s1597_s5 = scalar_lea.hbm %s305_s7, 16  ;;  %p1600_p8 = scmp.lt.u32.totalorder %s305_s7, %s2196_s1 }
 0x1b5   :  { %p1598_p7 = scmp.ne.s32.totalorder %s305_s7, %s1597_s5  ;;  %p1601_p9 = scmp.lt.u32.totalorder %s1819_s8, %s1597_s5 }
 0x1b6   :  { %p1603_p11 = scmp.lt.u32.totalorder %s1597_s5, %s305_s7 }
 0x1b7   :  { %p1602_p10 = por %p1601_p9, %p1600_p8 }
 0x1b9   :  { %p1604_p12 = por %p1603_p11, %p1602_p10 }
 0x1bb   :  { %p1605_p13 = pnand %p1604_p12, %p1598_p7 }
 0x1bd   :  { %1608 = shalt.err (!%p1605_p13)  }
 0x1be   :  { %s1609_s9 = scalar_lea.vmem %s315_s25, 16  ;;  %p1614_p1 = scmp.lt.s32.totalorder %s315_s25, %s1802_s21 }
 0x1bf   :  { %p1610_p0 = scmp.ne.s32.totalorder %s315_s25, %s1609_s9  ;;  %p1615_p2 = scmp.lt.s32.totalorder %s1828_s12, %s1609_s9 }
 0x1c1   :  { %p1616_p3 = por %p1615_p2, %p1614_p1 }
 0x1c3   :  { %p1617_p4 = pnand %p1616_p3, %p1610_p0 }
 0x1c5   :  { %1620 = shalt.err (!%p1617_p4)  }
 0x1c6   :  { %317 = dma.hbm_to_vmem [thread:$0]  %s305_s7, 16, %s315_s25, [#allocation3] }
 0x1c7   :  { %s1046_s11 = sshll.u32 %s2113_s30, 4  ;;  %s1767_s0 = smov [#allocation2 + $0x15]  }
 0x1c8   :  { %s344_s14 = sshll.u32 %s1767_s0, 4  ;;  %s320_s10 = scalar_lea.hbm %s2196_s1, %s1046_s11  ;;  %s2133_s14 = int_to_ptr.vmem [resolvable:$true] %s344_s14 }
 0x1c9   :  { %s1621_s16 = scalar_lea.hbm %s320_s10, 16  ;;  %p1624_p6 = scmp.lt.u32.totalorder %s320_s10, %s2196_s1 }
 0x1ca   :  { %p1622_p5 = scmp.ne.s32.totalorder %s320_s10, %s1621_s16  ;;  %p1625_p7 = scmp.lt.u32.totalorder %s1819_s8, %s1621_s16 }
 0x1cb   :  { %p1627_p9 = scmp.lt.u32.totalorder %s1621_s16, %s320_s10 }
 0x1cc   :  { %p1626_p8 = por %p1625_p7, %p1624_p6 }
 0x1ce   :  { %p1628_p10 = por %p1627_p9, %p1626_p8 }
 0x1d0   :  { %p1629_p11 = pnand %p1628_p10, %p1622_p5 }
 0x1d2   :  { %1632 = shalt.err (!%p1629_p11)  }
 0x1d3   :  { %s1633_s22 = scalar_lea.vmem %s2118_s28, 16  ;;  %p1638_p13 = scmp.lt.s32.totalorder %s2118_s28, %s1802_s21 }
 0x1d4   :  { %p1634_p12 = scmp.ne.s32.totalorder %s2118_s28, %s1633_s22  ;;  %p1639_p0 = scmp.lt.s32.totalorder %s1828_s12, %s1633_s22 }
 0x1d6   :  { %p1640_p1 = por %p1639_p0, %p1638_p13 }
 0x1d8   :  { %p1641_p2 = pnand %p1640_p1, %p1634_p12 }
 0x1da   :  { %1644 = shalt.err (!%p1641_p2)  }
 0x1db   :  { %332 = dma.hbm_to_vmem [thread:$0]  %s320_s10, 16, %s2118_s28, [#allocation3] }
 0x1dc   :  { %s1048_s23 = sshll.u32 %s2115_s29, 4  ;;  %s1049_s18 = sld [smem:[#allocation5 + $0x16]] }
 0x1dd   :  { %s335_s30 = scalar_lea.hbm %s2196_s1, %s1048_s23 }
 0x1de   :  { %s1645_s26 = scalar_lea.hbm %s335_s30, 16  ;;  %p1648_p4 = scmp.lt.u32.totalorder %s335_s30, %s2196_s1 }
 0x1df   :  { %p1646_p3 = scmp.ne.s32.totalorder %s335_s30, %s1645_s26  ;;  %p1649_p5 = scmp.lt.u32.totalorder %s1819_s8, %s1645_s26 }
 0x1e0   :  { %p1651_p7 = scmp.lt.u32.totalorder %s1645_s26, %s335_s30 }
 0x1e1   :  { %p1650_p6 = por %p1649_p5, %p1648_p4 }
 0x1e3   :  { %p1652_p8 = por %p1651_p7, %p1650_p6 }
 0x1e5   :  { %p1653_p9 = pnand %p1652_p8, %p1646_p3 }
 0x1e7   :  { %1656 = shalt.err (!%p1653_p9)  }
 0x1e8   :  { %s1657_s28 = scalar_lea.vmem %s2133_s14, 16  ;;  %p1662_p11 = scmp.lt.s32.totalorder %s2133_s14, %s1802_s21 }
 0x1e9   :  { %p1658_p10 = scmp.ne.s32.totalorder %s2133_s14, %s1657_s28  ;;  %p1663_p12 = scmp.lt.s32.totalorder %s1828_s12, %s1657_s28 }
 0x1eb   :  { %p1664_p13 = por %p1663_p12, %p1662_p11 }
 0x1ed   :  { %p1665_p0 = pnand %p1664_p13, %p1658_p10 }
 0x1ef   :  { %1668 = shalt.err (!%p1665_p0)  }
 0x1f0   :  { %347 = dma.hbm_to_vmem [thread:$0]  %s335_s30, 16, %s2133_s14, [#allocation3] }
 0x1f1   :  { %s1768_s29 = smov [#allocation2 + $0x16]   ;;  %s1051_s7 = sld [smem:[#allocation5 + $0x17]] }
 0x1f2   :  { %s359_s4 = sshll.u32 %s1768_s29, 4  ;;  %s1769_s5 = smov [#allocation2 + $0x17]   ;;  %s360_s4 = int_to_ptr.vmem [resolvable:$true] %s359_s4 }
 0x1f3   :  { %s374_s27 = sshll.u32 %s1769_s5, 4  ;;  %s1050_s6 = sshll.u32 %s1049_s18, 4  ;;  %s2162_s27 = int_to_ptr.vmem [resolvable:$true] %s374_s27 }
 0x1f4   :  { %s350_s0 = scalar_lea.hbm %s2196_s1, %s1050_s6 }
 0x1f5   :  { %s1669_s15 = scalar_lea.hbm %s350_s0, 16  ;;  %p1672_p2 = scmp.lt.u32.totalorder %s350_s0, %s2196_s1 }
 0x1f6   :  { %p1670_p1 = scmp.ne.s32.totalorder %s350_s0, %s1669_s15  ;;  %p1673_p3 = scmp.lt.u32.totalorder %s1819_s8, %s1669_s15 }
 0x1f7   :  { %p1675_p5 = scmp.lt.u32.totalorder %s1669_s15, %s350_s0 }
 0x1f8   :  { %p1674_p4 = por %p1673_p3, %p1672_p2 }
 0x1fa   :  { %p1676_p6 = por %p1675_p5, %p1674_p4 }
 0x1fc   :  { %p1677_p7 = pnand %p1676_p6, %p1670_p1 }
 0x1fe   :  { %1680 = shalt.err (!%p1677_p7)  }
 0x1ff   :  { %s1681_s14 = scalar_lea.vmem %s360_s4, 16  ;;  %p1686_p9 = scmp.lt.s32.totalorder %s360_s4, %s1802_s21 }
 0x200   :  { %p1682_p8 = scmp.ne.s32.totalorder %s360_s4, %s1681_s14  ;;  %p1687_p10 = scmp.lt.s32.totalorder %s1828_s12, %s1681_s14 }
 0x202   :  { %p1688_p11 = por %p1687_p10, %p1686_p9 }
 0x204   :  { %p1689_p12 = pnand %p1688_p11, %p1682_p8 }
 0x206   :  { %1692 = shalt.err (!%p1689_p12)  }
 0x207   :  { %362 = dma.hbm_to_vmem [thread:$0]  %s350_s0, 16, %s360_s4, [#allocation3] }
 0x208   :  { %s1052_s16 = sshll.u32 %s1051_s7, 4 }
 0x209   :  { %s365_s22 = scalar_lea.hbm %s2196_s1, %s1052_s16 }
 0x20a   :  { %s1693_s23 = scalar_lea.hbm %s365_s22, 16  ;;  %p1696_p0 = scmp.lt.u32.totalorder %s365_s22, %s2196_s1 }
 0x20b   :  { %p1694_p13 = scmp.ne.s32.totalorder %s365_s22, %s1693_s23  ;;  %p1697_p1 = scmp.lt.u32.totalorder %s1819_s8, %s1693_s23 }
 0x20c   :  { %p1699_p3 = scmp.lt.u32.totalorder %s1693_s23, %s365_s22 }
 0x20d   :  { %p1698_p2 = por %p1697_p1, %p1696_p0 }
 0x20f   :  { %p1700_p4 = por %p1699_p3, %p1698_p2 }
 0x211   :  { %p1701_p5 = pnand %p1700_p4, %p1694_p13 }
 0x213   :  { %1704 = shalt.err (!%p1701_p5)  }
 0x214   :  { %s1705_s25 = scalar_lea.vmem %s2162_s27, 16  ;;  %p1710_p7 = scmp.lt.s32.totalorder %s2162_s27, %s1802_s21 }
 0x215   :  { %p1706_p6 = scmp.ne.s32.totalorder %s2162_s27, %s1705_s25  ;;  %p1711_p8 = scmp.lt.s32.totalorder %s1828_s12, %s1705_s25 }
 0x217   :  { %p1712_p9 = por %p1711_p8, %p1710_p7 }
 0x219   :  { %p1713_p10 = pnand %p1712_p9, %p1706_p6 }
 0x21b   :  { %1716 = shalt.err (!%p1713_p10)  }
 0x21c   :  { %377 = dma.hbm_to_vmem [thread:$0]  %s365_s22, 16, %s2162_s27, [#allocation3] }
 0x21d   :  { %1741 = dma.done.wait [#allocation3], 384 }
 0x21e   :  { %1742 = vsyncadd [#allocation3], 4294966912  ;;  %s1770_s1 = smov [#allocation6]   ;;  %v797_v0 = vld [vmem:[#allocation2] sm:$0xff]  ;;  %v798_v1 = vld [vmem:[#allocation2 + $0x8] sm:$0xff] }
 0x21f   :  { %s811_s8 = sshll.u32 %s1770_s1, 4  ;;  %v799_v2 = vld [vmem:[#allocation2 + $0x10] sm:$0xff]  ;;  %v800_v3 = vmul.f32 11.313708, %v797_v0  ;;  %v801_v4 = vmul.f32 11.313708, %v798_v1  ;;  %s812_s8 = int_to_ptr.vmem [resolvable:$true] %s811_s8 }
 0x220   :  { %v802_v5 = vmul.f32 11.313708, %v799_v2  ;;  %s1717_s21 = scalar_lea.vmem %s812_s8, 384  ;;  %p1722_p12 = scmp.lt.s32.totalorder %s812_s8, %s812_s8 }
 0x221   :  { %803 = vst [vmem:[#allocation6] sm:$0xff] %v800_v3  ;;  %804 = vst [vmem:[#allocation6 + $0x8] sm:$0xff] %v801_v4  ;;  %p1718_p11 = scmp.ne.s32.totalorder %s812_s8, %s1717_s21  ;;  %p1723_p13 = scmp.lt.s32.totalorder %s1717_s21, %s1717_s21 }
 0x222   :  { %805 = vst [vmem:[#allocation6 + $0x10] sm:$0xff] %v802_v5 }
 0x223   :  { %p1724_p0 = por %p1723_p13, %p1722_p12 }
 0x225   :  { %p1725_p1 = pnand %p1724_p0, %p1718_p11 }
 0x227   :  { %1728 = shalt.err (!%p1725_p1)
}
 0x228   :  { %s1729_s26 = scalar_lea.hbm %s2197_s2, 384 }
 0x229   :  { %p1730_p2 = scmp.ne.s32.totalorder %s2197_s2, %s1729_s26  ;;  %p1733_p3 = scmp.lt.u32.totalorder %s1729_s26, %s2197_s2 }
 0x22b   :  { %p1735_p4 = pnand %p1733_p3, %p1730_p2 }
 0x22d   :  { %1738 = shalt.err (!%p1735_p4)
}
 0x22e   :  { %s1771_s4 = smov 128   ;;  %s1772_s7 = smov 8  }
 0x22f   :  { %817 = dma.vmem_to_hbm [thread:$0]  %s812_s8, 384, %s2197_s2, [#allocation7], %s1771_s4, %s1771_s4, %s1772_s7  }
 0x230   :  { %1743 = dma.done.wait [#allocation7], 384  }
 0x231   :  { %1744 = vsyncadd [#allocation7], 4294966912 }
 0x232   :  { %821 = vsyncpa [#allocation7], 1 }
 0x233   :  { %822 = vsyncmov [#allocation3] }
 0x236   :  { %s823_s6 = vpop.sfrf %822 }
 0x237   :  { %p1101_p5 = scmp.ne.s32.totalorder %s823_s6, 0 }
 0x239   :  { %827 = shalt.err (%p1101_p5)  }
 0x23a   :  { %829 = vsyncmov [#allocation3 + $0x1] }
 0x23d   :  { %s830_s9 = vpop.sfrf %829 }
 0x23e   :  { %p1102_p6 = scmp.ne.s32.totalorder %s830_s9, 0 }
 0x240   :  { %834 = shalt.err (%p1102_p6)  }

</bundles_post_ra>
